<compile_context>
chip_gen: v5e
topology: v5e:2x2
jax: 0.10.0
libtpu: 0.0.40
codegen_flags: <defaults>
</compile_context>

<pallas_src>
import functools
import math

import jax
import jax.numpy as jnp
from jax.experimental import pallas as pl
from jax.experimental.pallas import tpu as pltpu

_MIB = 1024 * 1024


# ----------------------------------------------------------------------------
# Kernel
# ----------------------------------------------------------------------------
def attention_kernel(x_ref, wqkv_ref, wproj_ref, bproj_ref, o_ref,
                     *, num_heads, head_dim, kv_tile):
    """Fused attention for one block of batch elements.

    x_ref:     (Bblk, N, C)  VMEM, input dtype (cast to bf16 in-kernel)
    wqkv_ref:  (C, 3C)       VMEM, bf16 (transposed nn.Linear weight; softmax
                             scale already folded into the Q columns)
    wproj_ref: (C, C)        VMEM, bf16 (transposed nn.Linear weight)
    bproj_ref: (1, C)        VMEM, f32
    o_ref:     (Bblk, N, C)  VMEM, output dtype
    """
    blk_b, N, C = x_ref.shape
    H, hd = num_heads, head_dim
    G = blk_b * H
    num_kv = N // kv_tile

    # ---- fused QKV projection: one MXU matmul over all Bblk*N rows ----------
    # In-kernel cast (free VPU filler) instead of a wrapper-side HBM pass.
    if blk_b == 1:
        x2d = x_ref[0].astype(jnp.bfloat16)                   # (N, C)
    else:
        x2d = x_ref[...].reshape(blk_b * N, C).astype(jnp.bfloat16)
    qkv = jnp.dot(x2d, wqkv_ref[...],
                  preferred_element_type=jnp.float32)         # (M, 3C) f32 acc
    qkv = qkv.astype(jnp.bfloat16)

    def split_heads(t2d):                                     # (M, C) -> (G, N, hd)
        if blk_b == 1:
            return jnp.transpose(t2d.reshape(N, H, hd), (1, 0, 2))
        t = t2d.reshape(blk_b, N, H, hd)
        return jnp.swapaxes(t, 1, 2).reshape(G, N, hd)

    q = split_heads(qkv[:, :C])           # scale pre-folded into wqkv Q columns
    k = split_heads(qkv[:, C:2 * C])
    v = split_heads(qkv[:, 2 * C:])

    # ---- head-batched attention with online softmax over KV tiles -----------
    # Only a (G, N, kv_tile) score tile is ever live (never (G, N, N)).
    m = l = acc = None
    for j in range(num_kv):                                   # static unroll
        kj = k[:, j * kv_tile:(j + 1) * kv_tile, :]
        vj = v[:, j * kv_tile:(j + 1) * kv_tile, :]
        s = jnp.einsum('gnd,gmd->gnm', q, kj,
                       preferred_element_type=jnp.float32)    # (G, N, kt) f32
        tile_max = jnp.max(s, axis=-1, keepdims=True)
        if j == 0:
            m_new = tile_max
            p = jnp.exp(s - m_new)
            l = jnp.sum(p, axis=-1, keepdims=True)
            acc = jnp.einsum('gnm,gmd->gnd', p.astype(jnp.bfloat16), vj,
                             preferred_element_type=jnp.float32)
        else:
            m_new = jnp.maximum(m, tile_max)
            alpha = jnp.exp(m - m_new)
            p = jnp.exp(s - m_new)
            l = alpha * l + jnp.sum(p, axis=-1, keepdims=True)
            acc = alpha * acc + jnp.einsum('gnm,gmd->gnd',
                                           p.astype(jnp.bfloat16), vj,
                                           preferred_element_type=jnp.float32)
        m = m_new
    # Normalize AFTER P@V; exact reciprocal on the tiny (G, N, 1) row-sums.
    acc = acc * pl.reciprocal(l, approx=False)

    # ---- merge heads back and output projection ------------------------------
    if blk_b == 1:
        attn2d = jnp.transpose(acc, (1, 0, 2)).reshape(N, C)
    else:
        attn2d = jnp.swapaxes(acc.reshape(blk_b, H, N, hd), 1, 2)
        attn2d = attn2d.reshape(blk_b * N, C)

    y = jnp.dot(attn2d.astype(jnp.bfloat16), wproj_ref[...],
                preferred_element_type=jnp.float32) + bproj_ref[...]

    if blk_b == 1:
        o_ref[0] = y.astype(o_ref.dtype)
    else:
        o_ref[...] = y.reshape(blk_b, N, C).astype(o_ref.dtype)


# ----------------------------------------------------------------------------
# Host-side parameter prep (once per model, NOT per call)
# ----------------------------------------------------------------------------
def prepare_params(wqkv_t, wproj_t, bproj, *, num_heads):
    """Fold the softmax scale into the Q columns of wqkv; cast weights to bf16."""
    C = wproj_t.shape[0]
    scale = (C // num_heads) ** (-0.5)
    wqkv_scaled = wqkv_t.at[:, :C].multiply(scale)
    return (wqkv_scaled.astype(jnp.bfloat16),
            wproj_t.astype(jnp.bfloat16),
            bproj.astype(jnp.float32).reshape(1, C))


# ----------------------------------------------------------------------------
# VMEM-aware tiling
# ----------------------------------------------------------------------------
def _physical_vmem_bytes():
    try:
        info = pltpu.get_tpu_info()
        for attr in ("vmem_capacity_bytes", "vmem_size_bytes", "vmem_bytes"):
            v = getattr(info, attr, None)
            if v:
                return int(v)
    except Exception:
        pass
    return 64 * _MIB  # v7x per-TC size: the safe lower bound across v5e/v6e/v7x


def _vmem_limit_bytes():
    phys = _physical_vmem_bytes()
    # Leave headroom for compiler-internal scratch; never below the defaults.
    return int(max(32 * _MIB, min(phys - 8 * _MIB, 112 * _MIB)))


def _step_vmem_bytes(block_b, N, C, H, kv_tile, x_bytes, out_bytes):
    """Approximate per-grid-step VMEM footprint (pipeline buffers + compiler
    managed intermediates) used to size block_b / kv_tile."""
    M = block_b * N
    G = block_b * H
    blocks = 2 * M * C * x_bytes + 2 * M * C * out_bytes       # 2x-buffered in/out
    weights = 2 * (3 * C * C + C * C) * 2 + C * 4               # counted at 2x (safe)
    inter = (M * 3 * C * (4 + 2)            # qkv: f32 accum + bf16 copy
             + 3 * M * C * 2                # q, k, v (bf16)
             + G * N * kv_tile * (4 + 2)    # score tile f32 + prob tile bf16
             + M * C * 4                    # f32 softmax accumulator
             + M * C * (2 + 4)              # merged heads bf16 + projected f32
             + 4 * G * N * 4)               # m / l running stats (+ slack)
    return blocks + weights + inter


def _divisors_desc(n):
    return [d for d in range(n, 0, -1) if n % d == 0]


def _choose_tiling(B, N, C, H, x_bytes, out_bytes, budget):
    """Pick (block_b, kv_tile): largest batch block that fits the VMEM budget
    while leaving >= 2 grid steps (DMA/compute overlap, megacore), with a KV
    tile (>=128 lanes when possible) keeping the score tile inside budget."""
    kv_cands = [d for d in _divisors_desc(N) if d >= min(N, 128)]
    for bb in _divisors_desc(B):
        if B >= 2 and bb > B // 2:
            continue
        for kt in kv_cands:
            if _step_vmem_bytes(bb, N, C, H, kt, x_bytes, out_bytes) <= budget:
                return bb, kt
    return 1, kv_cands[-1]


def _weight_spec(shape, single_buffer):
    """Constant-index weight spec; single-buffered when supported (saves a
    duplicate ~8*C^2 bytes of bf16 weights — precious on v7x / v5e VMEM)."""
    idx = lambda b: (0,) * len(shape)
    if single_buffer:
        return pl.BlockSpec(shape, idx, pipeline_mode=pl.Buffered(1))
    return pl.BlockSpec(shape, idx)


# ----------------------------------------------------------------------------
# Wrapper
# ----------------------------------------------------------------------------
def attention_forward(x, wqkv_prep, wproj_prep, bproj_prep, *, num_heads,
                      block_b=None, kv_tile=None):
    """x: (B, N, C). Weights must come from `prepare_params`."""
    B, N, C = x.shape
    assert C % num_heads == 0
    head_dim = C // num_heads

    vmem_limit = _vmem_limit_bytes()
    budget = int(vmem_limit * 0.75)
    auto_bb, auto_kt = _choose_tiling(B, N, C, num_heads,
                                      x.dtype.itemsize, x.dtype.itemsize,
                                      budget)
    if block_b is None:
        block_b = auto_bb
    if kv_tile is None:
        kv_tile = auto_kt
    assert B % block_b == 0 and N % kv_tile == 0
    grid = (B // block_b,)

    kernel = functools.partial(attention_kernel, num_heads=num_heads,
                               head_dim=head_dim, kv_tile=kv_tile)

    def run(single_buffer_weights):
        # Note: at realistic dims (C >= 128) the (block_b, N, C) output block
        # is lane-dense; at toy C the store is masked but correct.
        return pl.pallas_call(
            kernel,
            out_shape=jax.ShapeDtypeStruct((B, N, C), x.dtype),
            grid=grid,
            in_specs=[
                pl.BlockSpec((block_b, N, C), lambda b: (b, 0, 0)),
                _weight_spec((C, 3 * C), single_buffer_weights),
                _weight_spec((C, C), single_buffer_weights),
                _weight_spec((1, C), single_buffer_weights),
            ],
            out_specs=pl.BlockSpec((block_b, N, C), lambda b: (b, 0, 0)),
            compiler_params=pltpu.CompilerParams(
                dimension_semantics=("parallel",),
                vmem_limit_bytes=int(vmem_limit)),
        )(x, wqkv_prep, wproj_prep, bproj_prep)

    try:
        return run(True)
    except Exception:
        # pipeline_mode=pl.Buffered(1) unsupported on this jax/libtpu combo:
        # fall back to default (double-buffered) weight blocks.
        return run(False)


# ----------------------------------------------------------------------------
# Pure-JAX reference (mirrors the PyTorch forward pass)
# ----------------------------------------------------------------------------
def attention_reference(x, wqkv_t, wproj_t, bproj, *, num_heads,
                        matmul_dtype=jnp.float32):
    """`matmul_dtype=bf16` reproduces the kernel's matmul-input precision while
    keeping f32 accumulation and f32 softmax (apples-to-apples comparison)."""
    B, N, C = x.shape
    hd = C // num_heads
    scale = hd ** (-0.5)
    md = matmul_dtype
    qkv = jnp.dot(x.astype(md), wqkv_t.astype(md),
                  preferred_element_type=jnp.float32)          # (B, N, 3C)
    qkv = qkv.reshape(B, N, 3, num_heads, hd)
    qkv = jnp.transpose(qkv, (2, 0, 3, 1, 4))                  # (3, B, H, N, hd)
    q, k, v = qkv[0], qkv[1], qkv[2]
    attn = jnp.einsum('bhnd,bhmd->bhnm', (q * scale).astype(md), k.astype(md),
                      preferred_element_type=jnp.float32)
    attn = jax.nn.softmax(attn, axis=-1)
    o = jnp.einsum('bhnm,bhmd->bhnd', attn.astype(md), v.astype(md),
                   preferred_element_type=jnp.float32)          # (B, H, N, hd)
    o = jnp.transpose(o, (0, 2, 1, 3)).reshape(B, N, C)
    return jnp.dot(o.astype(md), wproj_t.astype(md),
                   preferred_element_type=jnp.float32) + bproj


if __name__ == "__main__":
    # Small, module-consistent shapes: B=2, N=8 (seq), C=32 (dim), 4 heads.
    B, N, C = 2, 8, 32
    num_heads = 4

    key = jax.random.PRNGKey(0)
    k_x, k_wqkv, k_wproj, k_bproj = jax.random.split(key, 4)

    x = jax.random.normal(k_x, (B, N, C), dtype=jnp.float32)

    # nn.Linear(dim, 3*dim, bias=False) and nn.Linear(dim, dim), stored
    # transposed as (in, out).
    wqkv_t = jax.random.normal(k_wqkv, (C, 3 * C), dtype=jnp.float32) / math.sqrt(C)
    wproj_t = jax.random.normal(k_wproj, (C, C), dtype=jnp.float32) / math.sqrt(C)
    bproj = jax.random.normal(k_bproj, (1, C), dtype=jnp.float32) * 0.01

    params = prepare_params(wqkv_t, wproj_t, bproj, num_heads=num_heads)
    out = attention_forward(x, *params, num_heads=num_heads)
    out = jax.block_until_ready(out)

    ref = attention_reference(x, wqkv_t, wproj_t, bproj, num_heads=num_heads,
                              matmul_dtype=jnp.bfloat16)
    assert out.shape == (B, N, C)
    assert jnp.allclose(out, ref, atol=3e-2, rtol=3e-2), "mismatch vs reference"

    print("KERNEL_OK")
</pallas_src>

<mosaic_0001>
module attributes {stable_mosaic.version = 11 : i64} {
  func.func @attention_kernel(%arg0: i32, %arg1: memref<1x8x32xf32, #tpu.memory_space<vmem>>, %arg2: memref<32x96xbf16, #tpu.memory_space<vmem>>, %arg3: memref<32x32xbf16, #tpu.memory_space<vmem>>, %arg4: memref<1x32xf32, #tpu.memory_space<vmem>>, %arg5: memref<1x8x32xf32, #tpu.memory_space<vmem>>) attributes {dimension_semantics = [#tpu.dimension_semantics<parallel>], iteration_bounds = array<i64: 2>, scalar_prefetch = 0 : i64, scratch_operands = 0 : i64, tpu.core_type = #tpu.core_type<tc>, window_params = [{transform_indices = @transform_0, window_bounds = array<i64: 1, 8, 32>}, {pipeline_mode = #tpu.pipeline_mode<synchronous>, transform_indices = @transform_1, window_bounds = array<i64: 32, 96>}, {pipeline_mode = #tpu.pipeline_mode<synchronous>, transform_indices = @transform_2, window_bounds = array<i64: 32, 32>}, {pipeline_mode = #tpu.pipeline_mode<synchronous>, transform_indices = @transform_3, window_bounds = array<i64: 1, 32>}, {transform_indices = @transform_4, window_bounds = array<i64: 1, 8, 32>}]} {
    %c0 = arith.constant 0 : index
    %c0_0 = arith.constant 0 : index
    %c0_1 = arith.constant 0 : index
    %0 = vector.load %arg1[%c0, %c0_0, %c0_1] : memref<1x8x32xf32, #tpu.memory_space<vmem>>, vector<1x8x32xf32>
    %1 = vector.shape_cast %0 : vector<1x8x32xf32> to vector<8x32xf32>
    %2 = arith.truncf %1 : vector<8x32xf32> to vector<8x32xbf16>
    %c0_2 = arith.constant 0 : index
    %c0_3 = arith.constant 0 : index
    %3 = vector.load %arg2[%c0_2, %c0_3] : memref<32x96xbf16, #tpu.memory_space<vmem>>, vector<32x96xbf16>
    %cst = arith.constant dense<0.000000e+00> : vector<8x96xf32>
    %4 = tpu.matmul %2, %3, %cst {dimension_numbers = #tpu.dot_dimension_numbers<[1], [0], [0], [1], [0, 0, 1, 1], [], []>} : vector<8x32xbf16>, vector<32x96xbf16>, vector<8x96xf32> -> vector<8x96xf32>
    %5 = arith.truncf %4 : vector<8x96xf32> to vector<8x96xbf16>
    %6 = vector.extract_strided_slice %5 {offsets = [0, 0], sizes = [8, 32], strides = [1, 1]} : vector<8x96xbf16> to vector<8x32xbf16>
    %7 = vector.shape_cast %6 : vector<8x32xbf16> to vector<8x4x8xbf16>
    %8 = tpu.transpose %7, [1, 0, 2] : vector<8x4x8xbf16> -> vector<4x8x8xbf16>
    %9 = vector.extract_strided_slice %5 {offsets = [0, 32], sizes = [8, 32], strides = [1, 1]} : vector<8x96xbf16> to vector<8x32xbf16>
    %10 = vector.shape_cast %9 : vector<8x32xbf16> to vector<8x4x8xbf16>
    %11 = tpu.transpose %10, [1, 0, 2] : vector<8x4x8xbf16> -> vector<4x8x8xbf16>
    %12 = vector.extract_strided_slice %5 {offsets = [0, 64], sizes = [8, 32], strides = [1, 1]} : vector<8x96xbf16> to vector<8x32xbf16>
    %13 = vector.shape_cast %12 : vector<8x32xbf16> to vector<8x4x8xbf16>
    %14 = tpu.transpose %13, [1, 0, 2] : vector<8x4x8xbf16> -> vector<4x8x8xbf16>
    "tpu.trace_start"() <{level = 10 : i32, message = "gnd,gmd->gnm"}> : () -> ()
    %cst_4 = arith.constant dense<0.000000e+00> : vector<4x8x8xf32>
    %15 = tpu.matmul %8, %11, %cst_4 {dimension_numbers = #tpu.dot_dimension_numbers<[2], [2], [1], [1], [0, 0, 0, 1, 1, 1], [0], [0]>} : vector<4x8x8xbf16>, vector<4x8x8xbf16>, vector<4x8x8xf32> -> vector<4x8x8xf32>
    "tpu.trace_stop"() : () -> ()
    %cst_5 = arith.constant dense<0xFF800000> : vector<4x8xf32>
    %16 = vector.multi_reduction <maximumf>, %15, %cst_5 [2] : vector<4x8x8xf32> to vector<4x8xf32>
    %17 = vector.shape_cast %16 : vector<4x8xf32> to vector<4x8x1xf32>
    %18 = vector.broadcast %17 : vector<4x8x1xf32> to vector<4x8x8xf32>
    %19 = arith.subf %15, %18 : vector<4x8x8xf32>
    %20 = math.exp %19 : vector<4x8x8xf32>
    %cst_6 = arith.constant dense<0.000000e+00> : vector<4x8xf32>
    %21 = vector.multi_reduction <add>, %20, %cst_6 [2] : vector<4x8x8xf32> to vector<4x8xf32>
    %22 = vector.shape_cast %21 : vector<4x8xf32> to vector<4x8x1xf32>
    %23 = arith.truncf %20 : vector<4x8x8xf32> to vector<4x8x8xbf16>
    "tpu.trace_start"() <{level = 10 : i32, message = "gnm,gmd->gnd"}> : () -> ()
    %cst_7 = arith.constant dense<0.000000e+00> : vector<4x8x8xf32>
    %24 = tpu.matmul %23, %14, %cst_7 {dimension_numbers = #tpu.dot_dimension_numbers<[2], [1], [1], [2], [0, 0, 0, 1, 1, 2], [0], [0]>} : vector<4x8x8xbf16>, vector<4x8x8xbf16>, vector<4x8x8xf32> -> vector<4x8x8xf32>
    "tpu.trace_stop"() : () -> ()
    %25 = tpu.reciprocal %22 : vector<4x8x1xf32> -> vector<4x8x1xf32>
    %26 = vector.broadcast %25 : vector<4x8x1xf32> to vector<4x8x8xf32>
    %27 = arith.mulf %24, %26 : vector<4x8x8xf32>
    %28 = tpu.transpose %27, [1, 0, 2] : vector<4x8x8xf32> -> vector<8x4x8xf32>
    %29 = vector.shape_cast %28 : vector<8x4x8xf32> to vector<8x32xf32>
    %30 = arith.truncf %29 : vector<8x32xf32> to vector<8x32xbf16>
    %c0_8 = arith.constant 0 : index
    %c0_9 = arith.constant 0 : index
    %31 = vector.load %arg3[%c0_8, %c0_9] : memref<32x32xbf16, #tpu.memory_space<vmem>>, vector<32x32xbf16>
    %cst_10 = arith.constant dense<0.000000e+00> : vector<8x32xf32>
    %32 = tpu.matmul %30, %31, %cst_10 {dimension_numbers = #tpu.dot_dimension_numbers<[1], [0], [0], [1], [0, 0, 1, 1], [], []>} : vector<8x32xbf16>, vector<32x32xbf16>, vector<8x32xf32> -> vector<8x32xf32>
    %c0_11 = arith.constant 0 : index
    %c0_12 = arith.constant 0 : index
    %33 = vector.load %arg4[%c0_11, %c0_12] : memref<1x32xf32, #tpu.memory_space<vmem>>, vector<1x32xf32>
    %34 = vector.broadcast %33 : vector<1x32xf32> to vector<8x32xf32>
    %35 = arith.addf %32, %34 : vector<8x32xf32>
    %c0_13 = arith.constant 0 : index
    %c0_14 = arith.constant 0 : index
    %c0_15 = arith.constant 0 : index
    %36 = vector.load %arg5[%c0_13, %c0_14, %c0_15] : memref<1x8x32xf32, #tpu.memory_space<vmem>>, vector<1x8x32xf32>
    %37 = vector.shape_cast %36 : vector<1x8x32xf32> to vector<8x32xf32>
    %38 = vector.shape_cast %35 : vector<8x32xf32> to vector<1x8x32xf32>
    tpu.vector_store %arg5[%c0_13, %c0_14, %c0_15], %38 {strides = array<i32>} : memref<1x8x32xf32, #tpu.memory_space<vmem>>, vector<1x8x32xf32>,
    return
  }
  func.func @transform_0(%arg0: i32) -> (i32, i32, i32) {
    %c0_i32 = arith.constant 0 : i32
    %c0_i32_0 = arith.constant 0 : i32
    %c0_i32_1 = arith.constant 0 : i32
    return %arg0, %c0_i32, %c0_i32_0 : i32, i32, i32
  }
  func.func @transform_1(%arg0: i32) -> (i32, i32) {
    %c0_i32 = arith.constant 0 : i32
    %c0_i32_0 = arith.constant 0 : i32
    %c0_i32_1 = arith.constant 0 : i32
    return %c0_i32, %c0_i32_0 : i32, i32
  }
  func.func @transform_2(%arg0: i32) -> (i32, i32) {
    %c0_i32 = arith.constant 0 : i32
    %c0_i32_0 = arith.constant 0 : i32
    %c0_i32_1 = arith.constant 0 : i32
    return %c0_i32, %c0_i32_0 : i32, i32
  }
  func.func @transform_3(%arg0: i32) -> (i32, i32) {
    %c0_i32 = arith.constant 0 : i32
    %c0_i32_0 = arith.constant 0 : i32
    %c0_i32_1 = arith.constant 0 : i32
    return %c0_i32, %c0_i32_0 : i32, i32
  }
  func.func @transform_4(%arg0: i32) -> (i32, i32, i32) {
    %c0_i32 = arith.constant 0 : i32
    %c0_i32_0 = arith.constant 0 : i32
    %c0_i32_1 = arith.constant 0 : i32
    return %arg0, %c0_i32, %c0_i32_0 : i32, i32, i32
  }
}

module attributes {stable_mosaic.version = 11 : i64} {
  func.func @attention_kernel(%arg0: i32, %arg1: memref<1x8x32xf32, #tpu.memory_space<vmem>>, %arg2: memref<32x96xbf16, #tpu.memory_space<vmem>>, %arg3: memref<32x32xbf16, #tpu.memory_space<vmem>>, %arg4: memref<1x32xf32, #tpu.memory_space<vmem>>, %arg5: memref<1x8x32xf32, #tpu.memory_space<vmem>>) attributes {dimension_semantics = [#tpu.dimension_semantics<parallel>], iteration_bounds = array<i64: 2>, scalar_prefetch = 0 : i64, scratch_operands = 0 : i64, tpu.core_type = #tpu.core_type<tc>, window_params = [{transform_indices = @transform_0, window_bounds = array<i64: 1, 8, 32>}, {pipeline_mode = #tpu.pipeline_mode<synchronous>, transform_indices = @transform_1, window_bounds = array<i64: 32, 96>}, {pipeline_mode = #tpu.pipeline_mode<synchronous>, transform_indices = @transform_2, window_bounds = array<i64: 32, 32>}, {pipeline_mode = #tpu.pipeline_mode<synchronous>, transform_indices = @transform_3, window_bounds = array<i64: 1, 32>}, {transform_indices = @transform_4, window_bounds = array<i64: 1, 8, 32>}]} {
    %c0 = arith.constant 0 : index
    %c0_0 = arith.constant 0 : index
    %c0_1 = arith.constant 0 : index
    %0 = vector.load %arg1[%c0, %c0_0, %c0_1] : memref<1x8x32xf32, #tpu.memory_space<vmem>>, vector<1x8x32xf32>
    %1 = vector.shape_cast %0 : vector<1x8x32xf32> to vector<8x32xf32>
    %2 = arith.truncf %1 : vector<8x32xf32> to vector<8x32xbf16>
    %c0_2 = arith.constant 0 : index
    %c0_3 = arith.constant 0 : index
    %3 = vector.load %arg2[%c0_2, %c0_3] : memref<32x96xbf16, #tpu.memory_space<vmem>>, vector<32x96xbf16>
    %cst = arith.constant dense<0.000000e+00> : vector<8x96xf32>
    %4 = tpu.matmul %2, %3, %cst {dimension_numbers = #tpu.dot_dimension_numbers<[1], [0], [0], [1], [0, 0, 1, 1], [], []>} : vector<8x32xbf16>, vector<32x96xbf16>, vector<8x96xf32> -> vector<8x96xf32>
    %5 = arith.truncf %4 : vector<8x96xf32> to vector<8x96xbf16>
    %6 = vector.extract_strided_slice %5 {offsets = [0, 0], sizes = [8, 32], strides = [1, 1]} : vector<8x96xbf16> to vector<8x32xbf16>
    %7 = vector.shape_cast %6 : vector<8x32xbf16> to vector<8x4x8xbf16>
    %8 = tpu.transpose %7, [1, 0, 2] : vector<8x4x8xbf16> -> vector<4x8x8xbf16>
    %9 = vector.extract_strided_slice %5 {offsets = [0, 32], sizes = [8, 32], strides = [1, 1]} : vector<8x96xbf16> to vector<8x32xbf16>
    %10 = vector.shape_cast %9 : vector<8x32xbf16> to vector<8x4x8xbf16>
    %11 = tpu.transpose %10, [1, 0, 2] : vector<8x4x8xbf16> -> vector<4x8x8xbf16>
    %12 = vector.extract_strided_slice %5 {offsets = [0, 64], sizes = [8, 32], strides = [1, 1]} : vector<8x96xbf16> to vector<8x32xbf16>
    %13 = vector.shape_cast %12 : vector<8x32xbf16> to vector<8x4x8xbf16>
    %14 = tpu.transpose %13, [1, 0, 2] : vector<8x4x8xbf16> -> vector<4x8x8xbf16>
    "tpu.trace_start"() <{level = 10 : i32, message = "gnd,gmd->gnm"}> : () -> ()
    %cst_4 = arith.constant dense<0.000000e+00> : vector<4x8x8xf32>
    %15 = tpu.matmul %8, %11, %cst_4 {dimension_numbers = #tpu.dot_dimension_numbers<[2], [2], [1], [1], [0, 0, 0, 1, 1, 1], [0], [0]>} : vector<4x8x8xbf16>, vector<4x8x8xbf16>, vector<4x8x8xf32> -> vector<4x8x8xf32>
    "tpu.trace_stop"() : () -> ()
    %cst_5 = arith.constant dense<0xFF800000> : vector<4x8xf32>
    %16 = vector.multi_reduction <maximumf>, %15, %cst_5 [2] : vector<4x8x8xf32> to vector<4x8xf32>
    %17 = vector.shape_cast %16 : vector<4x8xf32> to vector<4x8x1xf32>
    %18 = vector.broadcast %17 : vector<4x8x1xf32> to vector<4x8x8xf32>
    %19 = arith.subf %15, %18 : vector<4x8x8xf32>
    %20 = math.exp %19 : vector<4x8x8xf32>
    %cst_6 = arith.constant dense<0.000000e+00> : vector<4x8xf32>
    %21 = vector.multi_reduction <add>, %20, %cst_6 [2] : vector<4x8x8xf32> to vector<4x8xf32>
    %22 = vector.shape_cast %21 : vector<4x8xf32> to vector<4x8x1xf32>
    %23 = arith.truncf %20 : vector<4x8x8xf32> to vector<4x8x8xbf16>
    "tpu.trace_start"() <{level = 10 : i32, message = "gnm,gmd->gnd"}> : () -> ()
    %cst_7 = arith.constant dense<0.000000e+00> : vector<4x8x8xf32>
    %24 = tpu.matmul %23, %14, %cst_7 {dimension_numbers = #tpu.dot_dimension_numbers<[2], [1], [1], [2], [0, 0, 0, 1, 1, 2], [0], [0]>} : vector<4x8x8xbf16>, vector<4x8x8xbf16>, vector<4x8x8xf32> -> vector<4x8x8xf32>
    "tpu.trace_stop"() : () -> ()
    %25 = tpu.reciprocal %22 : vector<4x8x1xf32> -> vector<4x8x1xf32>
    %26 = vector.broadcast %25 : vector<4x8x1xf32> to vector<4x8x8xf32>
    %27 = arith.mulf %24, %26 : vector<4x8x8xf32>
    %28 = tpu.transpose %27, [1, 0, 2] : vector<4x8x8xf32> -> vector<8x4x8xf32>
    %29 = vector.shape_cast %28 : vector<8x4x8xf32> to vector<8x32xf32>
    %30 = arith.truncf %29 : vector<8x32xf32> to vector<8x32xbf16>
    %c0_8 = arith.constant 0 : index
    %c0_9 = arith.constant 0 : index
    %31 = vector.load %arg3[%c0_8, %c0_9] : memref<32x32xbf16, #tpu.memory_space<vmem>>, vector<32x32xbf16>
    %cst_10 = arith.constant dense<0.000000e+00> : vector<8x32xf32>
    %32 = tpu.matmul %30, %31, %cst_10 {dimension_numbers = #tpu.dot_dimension_numbers<[1], [0], [0], [1], [0, 0, 1, 1], [], []>} : vector<8x32xbf16>, vector<32x32xbf16>, vector<8x32xf32> -> vector<8x32xf32>
    %c0_11 = arith.constant 0 : index
    %c0_12 = arith.constant 0 : index
    %33 = vector.load %arg4[%c0_11, %c0_12] : memref<1x32xf32, #tpu.memory_space<vmem>>, vector<1x32xf32>
    %34 = vector.broadcast %33 : vector<1x32xf32> to vector<8x32xf32>
    %35 = arith.addf %32, %34 : vector<8x32xf32>
    %c0_13 = arith.constant 0 : index
    %c0_14 = arith.constant 0 : index
    %c0_15 = arith.constant 0 : index
    %36 = vector.load %arg5[%c0_13, %c0_14, %c0_15] : memref<1x8x32xf32, #tpu.memory_space<vmem>>, vector<1x8x32xf32>
    %37 = vector.shape_cast %36 : vector<1x8x32xf32> to vector<8x32xf32>
    %38 = vector.shape_cast %35 : vector<8x32xf32> to vector<1x8x32xf32>
    tpu.vector_store %arg5[%c0_13, %c0_14, %c0_15], %38 {strides = array<i32>} : memref<1x8x32xf32, #tpu.memory_space<vmem>>, vector<1x8x32xf32>,
    return
  }
  func.func @transform_0(%arg0: i32) -> (i32, i32, i32) {
    %c0_i32 = arith.constant 0 : i32
    %c0_i32_0 = arith.constant 0 : i32
    %c0_i32_1 = arith.constant 0 : i32
    return %arg0, %c0_i32, %c0_i32_0 : i32, i32, i32
  }
  func.func @transform_1(%arg0: i32) -> (i32, i32) {
    %c0_i32 = arith.constant 0 : i32
    %c0_i32_0 = arith.constant 0 : i32
    %c0_i32_1 = arith.constant 0 : i32
    return %c0_i32, %c0_i32_0 : i32, i32
  }
  func.func @transform_2(%arg0: i32) -> (i32, i32) {
    %c0_i32 = arith.constant 0 : i32
    %c0_i32_0 = arith.constant 0 : i32
    %c0_i32_1 = arith.constant 0 : i32
    return %c0_i32, %c0_i32_0 : i32, i32
  }
  func.func @transform_3(%arg0: i32) -> (i32, i32) {
    %c0_i32 = arith.constant 0 : i32
    %c0_i32_0 = arith.constant 0 : i32
    %c0_i32_1 = arith.constant 0 : i32
    return %c0_i32, %c0_i32_0 : i32, i32
  }
  func.func @transform_4(%arg0: i32) -> (i32, i32, i32) {
    %c0_i32 = arith.constant 0 : i32
    %c0_i32_0 = arith.constant 0 : i32
    %c0_i32_1 = arith.constant 0 : i32
    return %arg0, %c0_i32, %c0_i32_0 : i32, i32, i32
  }
}

</mosaic_0001>

<bundles_post_ra>
// kernel: tpu_custom_call.1
= control target key start
LH: loop header
LB: loop body
LE: loop exit
PB: predicated region body
PF: predicated region fallthrough
CT: control target
= control target key end

     0   :  { %9 = vsyncpa [#allocation3], 0  ;;  %s1867_s0 = inlined_call_operand.hbm [shape: f32[2,8,32], index: 0, kind: input, shape index: {}]   ;;  %s1868_s1 = inlined_call_operand.hbm [shape: bf16[32,96], index: 1, kind: input, shape index: {}]   ;;  %s1869_s2 = inlined_call_operand.hbm [shape: bf16[32,32], index: 2, kind: input, shape index: {}]   ;;  %s1870_s3 = inlined_call_operand.vmem [shape: f32[1,32], index: 3, kind: input, shape index: {}]   ;;  %s1871_s4 = inlined_call_operand.hbm [shape: f32[2,8,32], index: 4, kind: output, shape index: {}]  }
   0x1   :  { %11 = vsyncpa [#allocation3 + $0x1], 0 }
   0x2   :  { %12 = vsyncpa [#allocation6], 0 }
   0x3   :  { %13 = vsyncpa [#allocation4], 0 }
   0x4   :  { %15 = vsyncpa [#allocation4 + $0x1], 0  ;;  %s1519_s15 = smov 0   ;;  %s1521_s16 = smov 0  }
   0x5   :  { %s1523_s17 = smov 0   ;;  %s1525_s18 = smov 0  }
   0x6 LB: > { %s152_s21 = sshll.u32 %s1868_s1, 4  ;;  %s1543_s22 = sadd.s32 4294967295, %s1478_s18   ;;  %s1478_s18 = sphi %s1525_s18, %s1882_s18   ;;  %s1474_s17 = sphi %s1523_s17, %s1881_s17   ;;  %s1470_s16 = sphi %s1521_s16, %s1880_s16   ;;  %s1466_s15 = sphi %s1519_s15, %s1879_s15   ;;  %s153_s21 = int_to_ptr.hbm [resolvable:$true] %s152_s21 }
   0x7   : > { %p1177_p0 = scmp.ge.s32.totalorder %s1478_s18, 1  ;;  %p42_p1 = scmp.eq.s32.totalorder %s1543_s22, 0 }
   0x8   : > { %p141_p2 = scmp.lt.s32.totalorder %s1478_s18, 3  ;;  %s1480_s24 = smov [#allocation5]  }
   0x9   : > { %s154_s25 = sshll.u32 %s1480_s24, 4  ;;  %s166_s28 = sshll.u32 %s1869_s2, 4  ;;  %s155_s25 = int_to_ptr.vmem [resolvable:$true] %s154_s25  ;;  %s167_s28 = int_to_ptr.hbm [resolvable:$true] %s166_s28 }
   0xa   : > { %p1548_p3 = pnand %p1177_p0, %p141_p2  ;;  %s1481_s29 = smov [#allocation7]  }
   0xb   : > { %s168_s30 = sshll.u32 %s1481_s29, 4  ;;  %s1482_s5 = smov 64   ;;  %s169_s30 = int_to_ptr.vmem [resolvable:$true] %s168_s30 }
   0xc   : > { %p1234_p4 = pneg %p1548_p3  ;;  %s1483_s6 = smov 4  }
   0xd   : > { %s1176_s7 = sadd.s32 4294967294, %s1478_s18   ;;  %s1562_s8 = sadd.s32 1, %s1478_s18  }
   0xe   : > { %p1235_p6 = pnand %p1234_p4, %p42_p1  ;;  %s25_s9 = ssub.s32 %s1478_s18, %s1562_s8 }
   0xf   : > { %s28_s10 = sadd.s32 1, %s1474_s17  ;;  %p26_p7 = scmp.eq.s32.totalorder %s25_s9, 0 }
  0x10   : > { %1237 = dma.hbm_to_vmem [thread:$0]  (!%p1235_p6), %s153_s21, 256, %s155_s25, [#allocation6], %s1482_s5, %s1482_s5, %s1483_s6  }
  0x11   : > { %1240 = dma.hbm_to_vmem [thread:$0]  (!%p1235_p6), %s167_s28, 256, %s169_s30, [#allocation6], %s1482_s5, %s1482_s5, %s1483_s6  }
  0x12   : > { %p35_p8 = scmp.ne.s32.totalorder %s1474_s17, %s1470_s16  ;;  %p36_p9 = scmp.eq.s32.totalorder %s1478_s18, 0 }
  0x13   : > { %p41_p10 = scmp.ne.s32.totalorder %s1470_s16, %s1466_s15  ;;  %p128_p13 = scmp.eq.s32.totalorder %s1543_s22, 1 }
  0x14   : > { %s1573_s11 = scalar_select %p26_p7, %s1474_s17, %s28_s10  }
  0x15   : > { %p1575_p11 = por %p36_p9, %p35_p8  ;;  %p1581_p12 = por %p42_p1, %p41_p10 }
  0x16   : > { %p134_p0 = scmp.eq.s32.totalorder %s1176_s7, 1  ;;  %p1251_p2 = scmp.lt.s32.totalorder %s1478_s18, 2 }
  0x17   : > { %s185_s14 = sand.u32 1, %s1474_s17   ;;  %p1588_p4 = por %p128_p13, %p35_p8 }
  0x18   : > { %p1592_p6 = por %p134_p0, %p41_p10  ;;  %s1181_s21 = sshll.u32 %s185_s14, 3 }
  0x19   : > { %s1182_s24 = sshll.u32 %s1478_s18, 3  ;;  %s189_s28 = scalar_lea.vmem [#allocation2], %s1181_s21 }
  0x1a   : > { %s193_s27 = scalar_lea.hbm %s1867_s0, %s1182_s24  ;;  %s197_s29 = sshll.u32 %s189_s28, 4  ;;  %s198_s29 = int_to_ptr.vmem [resolvable:$true] %s197_s29 }
  0x1b   : > { %s195_s30 = sshll.u32 %s193_s27, 4  ;;  %p1602_p7 = pnand %p1251_p2, %p1575_p11  ;;  %s196_s30 = int_to_ptr.hbm [resolvable:$true] %s195_s30 }
  0x1c   : > { %s186_s6 = scalar_lea.sflag [#allocation3], %s185_s14  ;;  %s1378_s7 = sshra.s32 %s196_s30, 4  ;;  %s1379_s7 = int_to_ptr.hbm [resolvable:$true] %s1378_s7 }
  0x1d   : > { %s1380_s9 = scalar_lea.hbm %s1379_s7, 8  ;;  %p1382_p9 = pneg %p1602_p7 }
  0x1e   : > { %p1381_p8 = scmp.ne.s32.totalorder %s1379_s7, %s1380_s9  ;;  %s1385_s24 = scalar_lea.hbm %s1867_s0, 16 }
  0x1f   : > { %p1386_p11 = scmp.lt.s32.totalorder %s1379_s7, %s1867_s0  ;;  %p1387_p0 = scmp.lt.s32.totalorder %s1385_s24, %s1380_s9 }
  0x20   : > { %p1383_p10 = pnand %p1382_p9, %p1381_p8 }
  0x21   : > { %p1388_p2 = por %p1387_p0, %p1386_p11 }
  0x22   : > { %p1384_p13 = pneg %p1383_p10 }
  0x24   : > { %p1389_p5 = pnand %p1388_p2, %p1384_p13 }
  0x26   : > { %1392 = shalt.err (!%p1389_p5)
}
  0x27   : > { %1244 = dma.hbm_to_vmem [thread:$0]  (!%p1602_p7), %s196_s30, 128, %s198_s29, %s186_s6  }
  0x28   : > { %206 = sbr.rel (%p1548_p3) target bundleno = 1133 (0x46d), region = 36  ;;  %s1619_s14 = sand.u32 (!%p1548_p3), 1, %s1470_s16  }
  0x29   : > { %s1184_s26 = sshll.u32 (!%p1548_p3), %s1619_s14, 3  ;;  %s209_s27 = scalar_lea.sflag (!%p1548_p3), [#allocation3], %s1619_s14 }
  0x2a   : > { %s212_s28 = scalar_lea.vmem (!%p1548_p3), [#allocation2], %s1184_s26 }
  0x2d   : > { %1453 = dma.done.wait (%p1581_p12), %s209_s27, 128  }
  0x2e   : > { %1455 = vsyncadd (%p1581_p12), %s209_s27, 4294967168 }
  0x2f   : > { %1457 = dma.done.wait (%p42_p1), [#allocation6], 512  }
  0x30   : > { %1459 = vsyncadd (%p42_p1), [#allocation6], 4294966784  ;;  %v1219_v0 = vld [vmem:[#allocation5 + $0x8] sm:$0xff]  ;;  %v1218_v1 = vld [vmem:[#allocation5] sm:$0xff]  ;;  %vm267_vm0 = vcmask 261120   ;;  %s1484_s23 = smov 104  }
  0x31   : > { %277 = vmatpush.bf16.msra.mxu0 %v1219_v0  ;;  %v249_v2 = vld [vmem:[%s212_s28] sm:$0xff]  ;;  %s1485_s13 = smov 120   ;;  %s1486_s29 = smov 96   ;;  %v1489_v7 = vmov 1983009808   ;;  %vm315_vm1 = vcmask 1047556  }
  0x32   : > { %v250_v3 = vpack.c.bf16 %v249_v2, %v249_v2  ;;  %s1487_s30 = smov 112   ;;  %s1488_s5 = smov 64   ;;  %v306_v8 = vunpack.c.l.s4 %v1489_v7  ;;  %v1490_v16 = vmov 1934713408   ;;  %vm651_vm2 = vcmask 64512  }
  0x33   : > { %v320_v17 = vunpack.c.l.s4 %v1490_v16  ;;  %vm771_vm3 = vcmask 1043456   ;;  %s1491_s6 = smov 24   ;;  %s1492_s7 = smov 16  }
  0x34   : > { %v1636_v12 = vunpack.c.0.s8 %v306_v8  ;;  %s1493_s9 = smov 8   ;;  %s1215_s10 = sshll.u32 %s1543_s22, 3 }
  0x35   : > { %278 = vmatpush.bf16.msra.mxu0 %v1218_v1  ;;  %v1641_v24 = vunpack.c.0.s8 %v320_v17  ;;  %s1082_s25 = scalar_lea.hbm %s1871_s4, %s1215_s10  ;;  %s247_s28 = scalar_lea.vmem [#allocation8], %s1184_s26 }
  0x36   : > { %s1072_s22 = scalar_lea.sflag [#allocation4], %s1619_s14  ;;  %s1428_s26 = scalar_lea.hbm %s1871_s4, 16 }
  0x38   : > { %1196 = vmatmul.msk.bf16.vlgmr.msra.gmra.mxu0 %vm267_vm0, %v250_v3 }
  0xb5   : > { %v280_v4 = vpop.f32.mrf.mxu0 }
  0xb6   : > { %v284_v5 = vpack.c.bf16 %v280_v4, %v280_v4 }
  0xb8   : > { %290 = vrot.lane.b32.xlu1 %v284_v5, %s1484_s23  ;;  %286 = vrot.lane.b32.xlu0 %v284_v5, %s1485_s13  ;;  %v295_v14 = vshrl.u32 %v284_v5, 16  ;;  %s1084_s23 = sshll.u32 %s247_s28, 4  ;;  %s1086_s13 = sshll.u32 %s1082_s25, 4  ;;  %s1085_s23 = int_to_ptr.vmem [resolvable:$true] %s1084_s23  ;;  %s1087_s13 = int_to_ptr.hbm [resolvable:$true] %s1086_s13 }
  0xbd   : > { %v282_v6 = vpop.f32.mrf.mxu0 }
  0xc0   : > { %407 = vrot.lane.b32.xlu1 %v284_v5, %s1486_s29  ;;  %288 = vrot.lane.b32.xlu0 %v284_v5, %s1487_s30 }
  0xc8   : > { %529 = vrot.lane.b32.xlu1 %v284_v5, %s1488_s5 }
 0x12a   : > { %v291_v9 = vpop.permute.xlu1 %290  ;;  %v287_v10 = vpop.permute.xlu0 %286 }
 0x12b   : > { %v296_v11 = vshrl.u32 %v287_v10, 16  ;;  %535 = vrot.lane.b32.xlu1 %v291_v9, %s1488_s5  ;;  %413 = vrot.lane.b32.xlu0 %v291_v9, %s1486_s29  ;;  %v294_v13 = vpack.i.b16 %v287_v10, %v284_v5  ;;  %v302_v20 = vshrl.u32 %v291_v9, 16 }
 0x12c   : > { %409 = vrot.lane.b32.xlu2 %v287_v10, %s1486_s29 }
 0x12d   : > { %v297_v15 = vpack.i.b16 %v296_v11, %v295_v14  ;;  %v308_v18 = vperm.slane %v294_v13, %v1636_v12 }
 0x12f   : > { %v335_v21 = vperm.slane %v297_v15, %v1636_v12  ;;  %v317_v25 = vrot.slane %v308_v18, 4 }
 0x131   : > { %v343_v28 = vrot.slane %v335_v21, 4 }
 0x132   : > { %v289_v19 = vpop.permute.xlu0 %288  ;;  %v408_v15 = vpop.permute.xlu1 %407 }
 0x133   : > { %v300_v22 = vpack.i.b16 %v291_v9, %v289_v19  ;;  %v301_v23 = vshrl.u32 %v289_v19, 16  ;;  %533 = vrot.lane.b32.xlu0 %v289_v19, %s1488_s5  ;;  %v418_v17 = vshrl.u32 %v408_v15, 16 }
 0x134   : > { %411 = vrot.lane.b32.xlu2 %v289_v19, %s1486_s29  ;;  %s1422_s29 = sshra.s32 %s1087_s13, 4  ;;  %s1423_s29 = int_to_ptr.hbm [resolvable:$true] %s1422_s29 }
 0x135   : > { %v303_v26 = vpack.i.b16 %v302_v20, %v301_v23  ;;  %v313_v27 = vperm.slane %v300_v22, %v1636_v12  ;;  %s1424_s30 = scalar_lea.hbm %s1423_s29, 8  ;;  %p1429_p12 = scmp.lt.s32.totalorder %s1423_s29, %s1871_s4 }
 0x136   : > { %p1425_p1 = scmp.ne.s32.totalorder %s1423_s29, %s1424_s30  ;;  %p1430_p7 = scmp.lt.s32.totalorder %s1428_s26, %s1424_s30 }
 0x137   : > { %v314_v29 = vrot.slane %v313_v27, 4  ;;  %v318_v30 = vsel %vm315_vm1, %v313_v27, %v317_v25  ;;  %v340_v31 = vperm.slane %v303_v26, %v1636_v12 }
 0x138   : > { %v326_v32 = vperm.slane %v318_v30, %v1641_v24  ;;  %p1426_p3 = pnand %p1425_p1, %p1588_p4  ;;  %p1431_p8 = por %p1430_p7, %p1429_p12 }
 0x139   : > { %v316_v33 = vsel %vm315_vm1, %v314_v29, %v308_v18  ;;  %v341_v34 = vrot.slane %v340_v31, 4  ;;  %v344_v35 = vsel %vm315_vm1, %v340_v31, %v343_v28 }
 0x13a   : > { %v322_v36 = vperm.slane %v316_v33, %v1641_v24  ;;  %v329_v37 = vrot.slane %v326_v32, 4  ;;  %v352_v38 = vperm.slane %v344_v35, %v1641_v24  ;;  %p1427_p5 = pneg %p1426_p3 }
 0x13b   : > { %v342_v39 = vsel %vm315_vm1, %v341_v34, %v335_v21  ;;  %v530_v21 = vpop.permute.xlu1 %529 }
 0x13c   : > { %v327_v40 = vrot.slane %v322_v36, 4  ;;  %v330_v41 = vsel %vm315_vm1, 0, %v329_v37  ;;  %v348_v42 = vperm.slane %v342_v39, %v1641_v24  ;;  %v355_v43 = vrot.slane %v352_v38, 4  ;;  %531 = vrot.lane.b32.xlu2 %v287_v10, %s1488_s5  ;;  %p1432_p9 = pnand %p1431_p8, %p1427_p5 }
 0x13d   : > { %v362_v44 = vrot.slane %v330_v41, 4  ;;  %v357_v45 = vsel %vm315_vm1, %v329_v37, %v322_v36  ;;  %v540_v30 = vshrl.u32 %v530_v21, 16 }
 0x13e   : > { %v353_v46 = vrot.slane %v348_v42, 4  ;;  %v356_v47 = vsel %vm315_vm1, 0, %v355_v43  ;;  %v328_v48 = vsel %vm315_vm1, 0, %v327_v40  ;;  %v376_v51 = vsel %vm315_vm1, %v355_v43, %v348_v42 }
 0x13f   : > { %v381_v49 = vrot.slane %v356_v47, 4  ;;  %v363_v50 = vsel %vm315_vm1, %v362_v44, %v328_v48  ;;  %v361_v55 = vperm.slane %v357_v45, %v1636_v12  ;;  %v380_v59 = vperm.slane %v376_v51, %v1636_v12 }
 0x140   : > { %v354_v52 = vsel %vm315_vm1, 0, %v353_v46  ;;  %v367_v53 = vperm.slane %v363_v50, %v1636_v12 }
 0x141   : > { %v382_v54 = vsel %vm315_vm1, %v381_v49, %v354_v52 }
 0x142   : > { %v368_v56 = vrot.slane %v367_v53, 4  ;;  %v386_v57 = vperm.slane %v382_v54, %v1636_v12 }
 0x144   : > { %v369_v58 = vsel %vm315_vm1, %v368_v56, %v361_v55  ;;  %v387_v60 = vrot.slane %v386_v57, 4 }
 0x145   : > { %v1668_v61 = vperm.slane %v369_v58, %v1641_v24 }
 0x146   : > { %v388_v62 = vsel %vm315_vm1, %v387_v60, %v380_v59 }
 0x147   : > { %v1672_v63 = vperm.slane %v388_v62, %v1641_v24  ;;  %v374_v0 = vrot.slane %v1668_v61, 4  ;;  %v398_v1 = vshrl.u32 %v1668_v61, 16 }
 0x149   : > { %v397_v2 = vpack.i.b16 %v1672_v63, %v1668_v61  ;;  %v399_v3 = vshrl.u32 %v1672_v63, 16  ;;  %v1680_v4 = vsel %vm315_vm1, 0, %v374_v0  ;;  %v393_v5 = vrot.slane %v1672_v63, 4 }
 0x14a   : > { %v404_v9 = vshrl.u32 %v1680_v4, 16 }
 0x14b   : > { %v1683_v6 = vpack.i.b16 %v399_v3, %v398_v1  ;;  %v1686_v7 = vsel %vm315_vm1, 0, %v393_v5 }
 0x14c   : > { %v403_v8 = vpack.i.b16 %v1686_v7, %v1680_v4  ;;  %v405_v10 = vshrl.u32 %v1686_v7, 16 }
 0x14e   : > { %v1692_v11 = vpack.i.b16 %v405_v10, %v404_v9 }
 0x186   : > { %v410_v13 = vpop.permute.xlu2 %409 }
 0x187   : > { %v419_v16 = vshrl.u32 %v410_v13, 16  ;;  %v417_v18 = vpack.i.b16 %v410_v13, %v408_v15 }
 0x189   : > { %v420_v19 = vpack.i.b16 %v419_v16, %v418_v17  ;;  %v431_v22 = vperm.slane %v417_v18, %v1636_v12 }
 0x18b   : > { %v457_v26 = vperm.slane %v420_v19, %v1636_v12  ;;  %v439_v31 = vrot.slane %v431_v22, 4 }
 0x18d   : > { %v465_v36 = vrot.slane %v457_v26, 4 }
 0x18e   : > { %v412_v14 = vpop.permute.xlu2 %411 }
 0x18f   : > { %v424_v27 = vshrl.u32 %v412_v14, 16 }
 0x196   : > { %v532_v20 = vpop.permute.xlu2 %531 }
 0x197   : > { %v541_v23 = vshrl.u32 %v532_v20, 16  ;;  %v539_v32 = vpack.i.b16 %v532_v20, %v530_v21 }
 0x199   : > { %v542_v35 = vpack.i.b16 %v541_v23, %v540_v30  ;;  %v553_v42 = vperm.slane %v539_v32, %v1636_v12 }
 0x19b   : > { %v579_v46 = vperm.slane %v542_v35, %v1636_v12  ;;  %v561_v59 = vrot.slane %v553_v42, 4 }
 0x19d   : > { %v414_v25 = vpop.permute.xlu0 %413  ;;  %v536_v40 = vpop.permute.xlu1 %535  ;;  %v587_v1 = vrot.slane %v579_v46, 4 }
 0x19e   : > { %v423_v28 = vpack.i.b16 %v414_v25, %v412_v14  ;;  %v425_v29 = vshrl.u32 %v414_v25, 16  ;;  %v547_v51 = vshrl.u32 %v536_v40, 16 }
 0x1a0   : > { %v426_v33 = vpack.i.b16 %v425_v29, %v424_v27  ;;  %v436_v34 = vperm.slane %v423_v28, %v1636_v12 }
 0x1a2   : > { %v437_v37 = vrot.slane %v436_v34, 4  ;;  %v440_v38 = vsel %vm315_vm1, %v436_v34, %v439_v31  ;;  %v462_v39 = vperm.slane %v426_v33, %v1636_v12 }
 0x1a3   : > { %v448_v41 = vperm.slane %v440_v38, %v1641_v24 }
 0x1a4   : > { %v438_v43 = vsel %vm315_vm1, %v437_v37, %v431_v22  ;;  %v463_v44 = vrot.slane %v462_v39, 4  ;;  %v466_v45 = vsel %vm315_vm1, %v462_v39, %v465_v36 }
 0x1a5   : > { %v444_v47 = vperm.slane %v438_v43, %v1641_v24  ;;  %v451_v48 = vrot.slane %v448_v41, 4  ;;  %v474_v49 = vperm.slane %v466_v45, %v1641_v24  ;;  %v534_v50 = vpop.permute.xlu0 %533 }
 0x1a6   : > { %v464_v52 = vsel %vm315_vm1, %v463_v44, %v457_v26  ;;  %v545_v53 = vpack.i.b16 %v536_v40, %v534_v50  ;;  %v546_v54 = vshrl.u32 %v534_v50, 16 }
 0x1a7   : > { %v449_v55 = vrot.slane %v444_v47, 4  ;;  %v452_v56 = vsel %vm315_vm1, 0, %v451_v48  ;;  %v470_v57 = vperm.slane %v464_v52, %v1641_v24  ;;  %v477_v58 = vrot.slane %v474_v49, 4 }
 0x1a8   : > { %v484_v60 = vrot.slane %v452_v56, 4  ;;  %v548_v62 = vpack.i.b16 %v547_v51, %v546_v54  ;;  %v558_v0 = vperm.slane %v545_v53, %v1636_v12  ;;  %v479_v18 = vsel %vm315_vm1, %v451_v48, %v444_v47 }
 0x1a9   : > { %v450_v3 = vsel %vm315_vm1, 0, %v449_v55  ;;  %v475_v5 = vrot.slane %v470_v57, 4  ;;  %v478_v9 = vsel %vm315_vm1, 0, %v477_v58  ;;  %v498_v28 = vsel %vm315_vm1, %v477_v58, %v470_v57 }
 0x1aa   : > { %v503_v10 = vrot.slane %v478_v9, 4  ;;  %v559_v13 = vrot.slane %v558_v0, 4  ;;  %v562_v14 = vsel %vm315_vm1, %v558_v0, %v561_v59  ;;  %v584_v15 = vperm.slane %v548_v62, %v1636_v12 }
 0x1ab   : > { %v570_v16 = vperm.slane %v562_v14, %v1641_v24  ;;  %v476_v17 = vsel %vm315_vm1, 0, %v475_v5  ;;  %v485_v19 = vsel %vm315_vm1, %v484_v60, %v450_v3  ;;  %v483_v30 = vperm.slane %v479_v18, %v1636_v12 }
 0x1ac   : > { %v560_v20 = vsel %vm315_vm1, %v559_v13, %v553_v42  ;;  %v585_v21 = vrot.slane %v584_v15, 4  ;;  %v588_v22 = vsel %vm315_vm1, %v584_v15, %v587_v1  ;;  %v489_v23 = vperm.slane %v485_v19, %v1636_v12 }
 0x1ad   : > { %v566_v25 = vperm.slane %v560_v20, %v1641_v24  ;;  %v573_v26 = vrot.slane %v570_v16, 4  ;;  %v596_v27 = vperm.slane %v588_v22, %v1641_v24  ;;  %v504_v32 = vsel %vm315_vm1, %v503_v10, %v476_v17 }
 0x1ae   : > { %v586_v29 = vsel %vm315_vm1, %v585_v21, %v579_v46  ;;  %v490_v31 = vrot.slane %v489_v23, 4  ;;  %v502_v39 = vperm.slane %v498_v28, %v1636_v12  ;;  %v508_v40 = vperm.slane %v504_v32, %v1636_v12 }
 0x1af   : > { %v571_v33 = vrot.slane %v566_v25, 4  ;;  %v574_v34 = vsel %vm315_vm1, 0, %v573_v26  ;;  %v592_v35 = vperm.slane %v586_v29, %v1641_v24  ;;  %v599_v36 = vrot.slane %v596_v27, 4 }
 0x1b0   : > { %v606_v37 = vrot.slane %v574_v34, 4  ;;  %v491_v38 = vsel %vm315_vm1, %v490_v31, %v483_v30  ;;  %v509_v46 = vrot.slane %v508_v40, 4  ;;  %v601_v47 = vsel %vm315_vm1, %v573_v26, %v566_v25 }
 0x1b1   : > { %v572_v41 = vsel %vm315_vm1, 0, %v571_v33  ;;  %v597_v42 = vrot.slane %v592_v35, 4  ;;  %v600_v43 = vsel %vm315_vm1, 0, %v599_v36  ;;  %v495_v44 = vperm.slane %v491_v38, %v1641_v24 }
 0x1b2   : > { %v625_v45 = vrot.slane %v600_v43, 4  ;;  %v607_v48 = vsel %vm315_vm1, %v606_v37, %v572_v41  ;;  %v510_v52 = vsel %vm315_vm1, %v509_v46, %v502_v39  ;;  %v605_v55 = vperm.slane %v601_v47, %v1636_v12 }
 0x1b3   : > { %v496_v49 = vrot.slane %v495_v44, 4  ;;  %v598_v50 = vsel %vm315_vm1, 0, %v597_v42  ;;  %v611_v51 = vperm.slane %v607_v48, %v1636_v12  ;;  %v514_v54 = vperm.slane %v510_v52, %v1641_v24 }
 0x1b4   : > { %v626_v53 = vsel %vm315_vm1, %v625_v45, %v598_v50  ;;  %v620_v57 = vsel %vm315_vm1, %v599_v36, %v592_v35  ;;  %v520_v58 = vshrl.u32 %v495_v44, 16 }
 0x1b5   : > { %v612_v56 = vrot.slane %v611_v51, 4  ;;  %v497_v59 = vsel %vm315_vm1, 0, %v496_v49  ;;  %v630_v60 = vperm.slane %v626_v53, %v1636_v12  ;;  %v519_v62 = vpack.i.b16 %v514_v54, %v495_v44 }
 0x1b6   : > { %v521_v0 = vshrl.u32 %v514_v54, 16  ;;  %v515_v1 = vrot.slane %v514_v54, 4  ;;  %v624_v9 = vperm.slane %v620_v57, %v1636_v12  ;;  %v526_v17 = vshrl.u32 %v497_v59, 16 }
 0x1b7   : > { %v613_v3 = vsel %vm315_vm1, %v612_v56, %v605_v55  ;;  %v631_v10 = vrot.slane %v630_v60, 4  ;;  %v656_v13 = vsel %vm651_vm2, %v519_v62, 0 }
 0x1b8   : > { %v617_v5 = vperm.slane %v613_v3, %v1641_v24  ;;  %v522_v14 = vpack.i.b16 %v521_v0, %v520_v58  ;;  %v516_v15 = vsel %vm315_vm1, 0, %v515_v1  ;;  %665 = vmatpush.bf16.xpose.msra.mxu1 %v656_v13 }
 0x1b9   : > { %v525_v16 = vpack.i.b16 %v516_v15, %v497_v59  ;;  %v527_v18 = vshrl.u32 %v516_v15, 16  ;;  %v632_v19 = vsel %vm315_vm1, %v631_v10, %v624_v9 }
 0x1ba   : > { %v675_v20 = vsel %vm651_vm2, %v522_v14, 0  ;;  %v636_v21 = vperm.slane %v632_v19, %v1641_v24  ;;  %v618_v22 = vrot.slane %v617_v5, 4  ;;  %v642_v26 = vshrl.u32 %v617_v5, 16 }
 0x1bb   : > { %684 = vmatpush.bf16.xpose.msra.mxu2 %v675_v20  ;;  %v694_v23 = vsel %vm651_vm2, %v525_v16, 0  ;;  %v528_v25 = vpack.i.b16 %v527_v18, %v526_v17 }
 0x1bc   : > { %703 = vmatpush.bf16.xpose.msra.mxu3 %v694_v23  ;;  %v641_v27 = vpack.i.b16 %v636_v21, %v617_v5  ;;  %v643_v28 = vshrl.u32 %v636_v21, 16  ;;  %v619_v29 = vsel %vm315_vm1, 0, %v618_v22  ;;  %v637_v30 = vrot.slane %v636_v21, 4 }
 0x1bd   : > { %v713_v31 = vsel %vm651_vm2, %v528_v25, 0  ;;  %v648_v36 = vshrl.u32 %v619_v29, 16 }
 0x1be   : > { %722 = vmatpush.bf16.xpose.msrb.mxu0 %v713_v31  ;;  %v773_v32 = vsel %vm771_vm3, %v641_v27, 0  ;;  %v644_v33 = vpack.i.b16 %v643_v28, %v642_v26  ;;  %v638_v34 = vsel %vm315_vm1, 0, %v637_v30 }
 0x1bf   : > { %v647_v35 = vpack.i.b16 %v638_v34, %v619_v29  ;;  %v649_v37 = vshrl.u32 %v638_v34, 16  ;;  %1197 = vmatmul.msk.bf16.vlgmr.msra.gmra.mxu1 %vm651_vm2, %v397_v2 }
 0x1c0   : > { %782 = vmatpush.bf16.msrb.mxu1 %v773_v32  ;;  %v792_v38 = vsel %vm771_vm3, %v644_v33, 0 }
 0x1c1   : > { %v811_v39 = vsel %vm771_vm3, %v647_v35, 0  ;;  %v650_v40 = vpack.i.b16 %v649_v37, %v648_v36 }
 0x1c2   : > { %1198 = vmatmul.msk.bf16.vlgmr.msra.gmra.mxu2 %vm651_vm2, %v1683_v6 }
 0x1c3   : > { %801 = vmatpush.bf16.msrb.mxu2 %v792_v38  ;;  %1199 = vmatmul.msk.bf16.vlgmr.msra.gmra.mxu3 %vm651_vm2, %v403_v8  ;;  %v830_v41 = vsel %vm771_vm3, %v650_v40, 0 }
 0x1c4   : > { %820 = vmatpush.bf16.msrb.mxu3 %v811_v39 }
 0x1c5   : > { %1200 = vmatmul.msk.bf16.vlgmr.msrb.gmra.mxu0 %vm651_vm2, %v1692_v11 }
 0x1c6   : > { %839 = vmatpush.bf16.msra.mxu0 %v830_v41 }
 0x23c   : > { %v667_v61 = vpop.f32.mrf.mxu1 }
 0x23d   : > { %v728_v63 = vsel %vm651_vm2, %v667_v61, -inf }
 0x23e   : > { %729 = vmax.xlane.f32.xlu1 %v728_v63 }
 0x242   : > { %v724_v2 = vpop.f32.mrf.mxu0 }
 0x243   : > { %v737_v46 = vsel %vm651_vm2, %v724_v2, -inf }
 0x244   : > { %v669_v42 = vpop.f32.mrf.mxu1 }
 0x245   : > { %v686_v43 = vpop.f32.mrf.mxu2 }
 0x246   : > { %v705_v6 = vpop.f32.mrf.mxu3  ;;  %v731_v44 = vsel %vm651_vm2, %v686_v43, -inf }
 0x247   : > { %732 = vmax.xlane.f32.xlu0 %v731_v44  ;;  %v734_v4 = vsel %vm651_vm2, %v705_v6, -inf }
 0x248   : > { %735 = vmax.xlane.f32.xlu2 %v734_v4 }
 0x24a   : > { %v726_v7 = vpop.f32.mrf.mxu0 }
 0x24d   : > { %v688_v8 = vpop.f32.mrf.mxu2 }
 0x24e   : > { %v707_v45 = vpop.f32.mrf.mxu3 }
 0x250   : > { %738 = vmax.xlane.f32.xlu2 %v737_v46 }
 0x2b1   : > { %v730_v11 = vpop.xlane.xlu1 %729 }
 0x2b2   : > { %v740_v47 = vsub.f32 %v667_v61, %v730_v11 }
 0x2b4   : > { %v744_v48 = vmul.f32 1.442695, %v740_v47 }
 0x2b6   : > { %1302 = vpow2.f32 %v744_v48 }
 0x2ba   : > { %v733_v49 = vpop.xlane.xlu0 %732 }
 0x2bb   : > { %v741_v50 = vsub.f32 %v686_v43, %v733_v49  ;;  %v736_v51 = vpop.xlane.xlu2 %735 }
 0x2bc   : > { %v742_v52 = vsub.f32 %v705_v6, %v736_v51  ;;  %v1303_v53 = vpop.eup %1302 }
 0x2bd   : > { %v746_v54 = vmul.f32 1.442695, %v741_v50  ;;  %v752_v56 = vsel %vm651_vm2, %v1303_v53, 0.0  ;;  %v764_v57 = vpack.c.bf16 %v1303_v53, %v1303_v53 }
 0x2be   : > { %v748_v55 = vmul.f32 1.442695, %v742_v52  ;;  %753 = vadd.xlane.f32.xlu0 %v752_v56 }
 0x2bf   : > { %1304 = vpow2.f32 %v746_v54  ;;  %1201 = vmatmul.msk.bf16.vlgmr.msrb.gmra.mxu1 %vm651_vm2, %v764_v57 }
 0x2c0   : > { %1306 = vpow2.f32 %v748_v55 }
 0x2c3   : > { %v739_v58 = vpop.xlane.xlu2 %738 }
 0x2c4   : > { %v743_v59 = vsub.f32 %v724_v2, %v739_v58 }
 0x2c5   : > { %v1305_v60 = vpop.eup %1304 }
 0x2c6   : > { %v1307_v62 = vpop.eup %1306  ;;  %v750_v0 = vmul.f32 1.442695, %v743_v59  ;;  %v765_v1 = vpack.c.bf16 %v1305_v60, %v1305_v60  ;;  %v755_v13 = vsel %vm651_vm2, %v1305_v60, 0.0 }
 0x2c7   : > { %v758_v3 = vsel %vm651_vm2, %v1307_v62, 0.0  ;;  %v766_v5 = vpack.c.bf16 %v1307_v62, %v1307_v62 }
 0x2c8   : > { %1308 = vpow2.f32 %v750_v0  ;;  %1202 = vmatmul.msk.bf16.vlgmr.msrb.gmra.mxu2 %vm651_vm2, %v765_v1  ;;  %759 = vadd.xlane.f32.xlu2 %v758_v3 }
 0x2c9   : > { %1203 = vmatmul.msk.bf16.vlgmr.msrb.gmra.mxu3 %vm651_vm2, %v766_v5 }
 0x2ce   : > { %v1309_v9 = vpop.eup %1308 }
 0x2cf   : > { %v767_v10 = vpack.c.bf16 %v1309_v9, %v1309_v9  ;;  %v761_v14 = vsel %vm651_vm2, %v1309_v9, 0.0 }
 0x2d0   : > { %756 = vadd.xlane.f32.xlu2 %v755_v13  ;;  %762 = vadd.xlane.f32.xlu1 %v761_v14 }
 0x2d1   : > { %1204 = vmatmul.msk.bf16.vlgmr.msra.gmra.mxu0 %vm651_vm2, %v767_v10 }
 0x331   : > { %v754_v15 = vpop.xlane.xlu0 %753 }
 0x332   : > { %1310 = vrcp.f32 %v754_v15  ;;  %v856_v29 = vand.u32 2147483648, %v754_v15  ;;  %vm850_vm5 = vweird.f32 %v754_v15  ;;  %v854_v31 = vand.u32 2147483647, %v754_v15 }
 0x334   : > { %v857_v36 = vor.u32 1.1754944e-38, %v856_v29  ;;  %vm855_vm9 = vcmp.eq.f32.partialorder %v854_v31, 8.507059e+37 }
 0x338   : > { %v1311_v16 = vpop.eup %1310 }
 0x339   : > { %v846_v17 = vmul.f32 %v1311_v16, %v754_v15  ;;  %vm851_vm4 = vweird.f32 %v1311_v16 }
 0x33a   : > { %vm852_vm6 = vmor %vm850_vm5, %vm851_vm4 }
 0x33b   : > { %v760_v18 = vpop.xlane.xlu2 %759  ;;  %v847_v19 = vsub.f32 1.0, %v846_v17 }
 0x33c   : > { %1312 = vrcp.f32 %v760_v18  ;;  %v784_v20 = vpop.f32.mrf.mxu1  ;;  %v884_v32 = vand.u32 2147483648, %v760_v18  ;;  %v882_v34 = vand.u32 2147483647, %v760_v18  ;;  %vm878_vm8 = vweird.f32 %v760_v18 }
 0x33d   : > { %v848_v21 = vmul.f32 %v1311_v16, %v847_v19 }
 0x33e   : > { %v885_v39 = vor.u32 1.1754944e-38, %v884_v32  ;;  %vm883_vm11 = vcmp.eq.f32.partialorder %v882_v34, 8.507059e+37 }
 0x33f   : > { %v849_v27 = vadd.f32 %v1311_v16, %v848_v21 }
 0x341   : > { %v853_v35 = vsel %vm852_vm6, %v1311_v16, %v849_v27 }
 0x342   : > { %v1313_v22 = vpop.eup %1312  ;;  %v858_v41 = vsel %vm855_vm9, %v857_v36, %v853_v35 }
 0x343   : > { %v874_v23 = vmul.f32 %v1313_v22, %v760_v18  ;;  %v763_v25 = vpop.xlane.xlu1 %762  ;;  %v757_v26 = vpop.xlane.xlu2 %756  ;;  %vm879_vm7 = vweird.f32 %v1313_v22  ;;  %v901_v7 = vmul.f32 %v858_v41, %v784_v20 }
 0x344   : > { %1314 = vrcp.f32 %v763_v25  ;;  %v786_v30 = vpop.f32.mrf.mxu1  ;;  %vm880_vm10 = vmor %vm878_vm8, %vm879_vm7  ;;  %v870_v45 = vand.u32 2147483648, %v757_v26  ;;  %v898_v11 = vand.u32 2147483648, %v763_v25  ;;  %v896_v49 = vand.u32 2147483647, %v763_v25 }
 0x345   : > { %v875_v28 = vsub.f32 1.0, %v874_v23  ;;  %1316 = vrcp.f32 %v757_v26  ;;  %v868_v51 = vand.u32 2147483647, %v757_v26  ;;  %vm892_vm14 = vweird.f32 %v763_v25 }
 0x346   : > { %v908_v53 = vrot.slane %v901_v7, 4  ;;  %vm864_vm15 = vweird.f32 %v757_v26  ;;  %v899_v55 = vor.u32 1.1754944e-38, %v898_v11  ;;  %v871_v56 = vor.u32 1.1754944e-38, %v870_v45 }
 0x347   : > { %v876_v33 = vmul.f32 %v1313_v22, %v875_v28  ;;  %vm897_vm5 = vcmp.eq.f32.partialorder %v896_v49, 8.507059e+37  ;;  %vm869_vm6 = vcmp.eq.f32.partialorder %v868_v51, 8.507059e+37  ;;  %vm1029_vm7 = vcmask 130048  }
 0x348   : > { %vm1031_vm8 = vcmask 195584  }
 0x349   : > { %v877_v37 = vadd.f32 %v1313_v22, %v876_v33 }
 0x34a   : > { %v1315_v38 = vpop.eup %1314 }
 0x34b   : > { %v1317_v40 = vpop.eup %1316  ;;  %v888_v61 = vmul.f32 %v1315_v38, %v763_v25  ;;  %v803_v63 = vpop.f32.mrf.mxu2  ;;  %v881_v2 = vsel %vm880_vm10, %v1313_v22, %v877_v37  ;;  %vm893_vm12 = vweird.f32 %v1315_v38 }
 0x34c   : > { %v860_v42 = vmul.f32 %v1317_v40, %v757_v26  ;;  %v822_v43 = vpop.f32.mrf.mxu3  ;;  %v886_v6 = vsel %vm883_vm11, %v885_v39, %v881_v2  ;;  %vm865_vm13 = vweird.f32 %v1317_v40  ;;  %vm894_vm3 = vmor %vm892_vm14, %vm893_vm12 }
 0x34d   : > { %v889_v44 = vsub.f32 1.0, %v888_v61  ;;  %v903_v4 = vmul.f32 %v886_v6, %v822_v43  ;;  %vm866_vm4 = vmor %vm864_vm15, %vm865_vm13 }
 0x34e   : > { %v861_v8 = vsub.f32 1.0, %v860_v42  ;;  %v841_v46 = vpop.f32.mrf.mxu0 }
 0x34f   : > { %v905_v47 = vrot.slane %v903_v4, 4  ;;  %v890_v48 = vmul.f32 %v1315_v38, %v889_v44  ;;  %v909_v62 = vsel %vm315_vm1, %v903_v4, %v908_v53 }
 0x350   : > { %v862_v50 = vmul.f32 %v1317_v40, %v861_v8  ;;  %v917_v14 = vperm.slane %v909_v62, %v1636_v12 }
 0x351   : > { %v891_v52 = vadd.f32 %v1315_v38, %v890_v48  ;;  %v907_v57 = vsel %vm315_vm1, %v905_v47, %v901_v7 }
 0x352   : > { %v863_v54 = vadd.f32 %v1317_v40, %v862_v50  ;;  %v913_v10 = vperm.slane %v907_v57, %v1636_v12  ;;  %v944_v21 = vrot.slane %v917_v14, 4 }
 0x353   : > { %v895_v58 = vsel %vm894_vm3, %v1315_v38, %v891_v52  ;;  %v805_v59 = vpop.f32.mrf.mxu2 }
 0x354   : > { %v867_v60 = vsel %vm866_vm4, %v1317_v40, %v863_v54  ;;  %v900_v0 = vsel %vm897_vm5, %v899_v55, %v895_v58  ;;  %v824_v1 = vpop.f32.mrf.mxu3  ;;  %v932_v18 = vrot.slane %v913_v10, 4 }
 0x355   : > { %v872_v3 = vsel %vm869_vm6, %v871_v56, %v867_v60  ;;  %v904_v5 = vmul.f32 %v900_v0, %v841_v46  ;;  %v1221_v1 = vld [vmem:[#allocation7 + $0x8] sm:$0xff] }
 0x356   : > { %v902_v9 = vmul.f32 %v872_v3, %v803_v63  ;;  %v843_v13 = vpop.f32.mrf.mxu0  ;;  %1063 = vmatpush.bf16.msra.mxu1 %v1221_v1 }
 0x357   : > { %v918_v15 = vrot.slane %v904_v5, 4 }
 0x358   : > { %v920_v16 = vrot.slane %v902_v9, 4 }
 0x359   : > { %v919_v17 = vsel %vm315_vm1, %v918_v15, %v902_v9 }
 0x35a   : > { %v921_v19 = vsel %vm315_vm1, %v904_v5, %v920_v16  ;;  %v925_v20 = vperm.slane %v919_v17, %v1636_v12  ;;  %v1301_v16 = vld [vmem:[%s1870_s3] ss:$0 sm:$0xff] }
 0x35b   : > { %v929_v22 = vperm.slane %v921_v19, %v1636_v12 }
 0x35c   : > { %v930_v23 = vrot.slane %v925_v20, 4  ;;  %v933_v25 = vsel %vm315_vm1, %v925_v20, %v932_v18 }
 0x35d   : > { %v941_v26 = vperm.slane %v933_v25, %v1641_v24  ;;  %v942_v27 = vrot.slane %v929_v22, 4  ;;  %v945_v28 = vsel %vm315_vm1, %v929_v22, %v944_v21 }
 0x35e   : > { %v931_v29 = vsel %vm315_vm1, %v930_v23, %v913_v10  ;;  %v953_v30 = vperm.slane %v945_v28, %v1641_v24 }
 0x35f   : > { %v937_v31 = vperm.slane %v931_v29, %v1641_v24  ;;  %v943_v32 = vsel %vm315_vm1, %v942_v27, %v917_v14  ;;  %v956_v33 = vrot.slane %v941_v26, 4 }
 0x360   : > { %v949_v34 = vperm.slane %v943_v32, %v1641_v24  ;;  %v960_v35 = vrot.slane %v953_v30, 4 }
 0x361   : > { %v954_v36 = vrot.slane %v937_v31, 4  ;;  %v957_v37 = vsel %vm315_vm1, 0.0, %v956_v33  ;;  %v962_v38 = vsel %vm315_vm1, %v956_v33, %v937_v31 }
 0x362   : > { %v958_v39 = vrot.slane %v949_v34, 4  ;;  %v961_v40 = vsel %vm315_vm1, 0.0, %v960_v35  ;;  %v967_v41 = vrot.slane %v957_v37, 4  ;;  %v966_v61 = vperm.slane %v962_v38, %v1636_v12 }
 0x363   : > { %v978_v63 = vrot.slane %v961_v40, 4  ;;  %v955_v2 = vsel %vm315_vm1, 0.0, %v954_v36  ;;  %v973_v42 = vsel %vm315_vm1, %v960_v35, %v949_v34 }
 0x364   : > { %v959_v43 = vsel %vm315_vm1, 0.0, %v958_v39  ;;  %v968_v6 = vsel %vm315_vm1, %v967_v41, %v955_v2  ;;  %v977_v44 = vperm.slane %v973_v42, %v1636_v12  ;;  %v986_v4 = vrot.slane %v966_v61, 4 }
 0x365   : > { %v972_v7 = vperm.slane %v968_v6, %v1636_v12  ;;  %v979_v8 = vsel %vm315_vm1, %v978_v63, %v959_v43 }
 0x366   : > { %v983_v45 = vperm.slane %v979_v8, %v1636_v12  ;;  %v998_v46 = vrot.slane %v977_v44, 4 }
 0x367   : > { %v987_v11 = vsel %vm315_vm1, %v972_v7, %v986_v4  ;;  %v984_v47 = vrot.slane %v972_v7, 4 }
 0x368   : > { %v995_v48 = vperm.slane %v987_v11, %v1641_v24  ;;  %v999_v49 = vsel %vm315_vm1, %v983_v45, %v998_v46  ;;  %v996_v50 = vrot.slane %v983_v45, 4 }
 0x369   : > { %v1007_v51 = vperm.slane %v999_v49, %v1641_v24  ;;  %v985_v52 = vsel %vm315_vm1, %v984_v47, %v966_v61 }
 0x36a   : > { %v1014_v53 = vrot.slane %v995_v48, 4  ;;  %v991_v54 = vperm.slane %v985_v52, %v1641_v24  ;;  %v997_v55 = vsel %vm315_vm1, %v996_v50, %v977_v44 }
 0x36b   : > { %v1012_v56 = vrot.slane %v1007_v51, 4  ;;  %v1003_v12 = vperm.slane %v997_v55, %v1641_v24  ;;  %v1220_v24 = vld [vmem:[#allocation7] sm:$0xff] }
 0x36c   : > { %v1015_v57 = vsel %vm315_vm1, %v1007_v51, %v1014_v53  ;;  %v1010_v58 = vrot.slane %v991_v54, 4  ;;  %1064 = vmatpush.bf16.msra.mxu1 %v1220_v24 }
 0x36d   : > { %1025 = vrot.lane.b32.xlu2 %v1015_v57, %s1491_s6  ;;  %v1013_v59 = vsel %vm315_vm1, %v1012_v56, %v995_v48  ;;  %v1008_v60 = vrot.slane %v1003_v12, 4 }
 0x36e   : > { %1021 = vrot.lane.b32.xlu1 %v1013_v59, %s1492_s7  ;;  %v1011_v62 = vsel %vm315_vm1, %v1003_v12, %v1010_v58 }
 0x36f   : > { %1017 = vrot.lane.b32.xlu0 %v1011_v62, %s1493_s9  ;;  %v1009_v0 = vsel %vm315_vm1, %v1008_v60, %v991_v54 }
 0x3c7   : > { %v1026_v10 = vpop.permute.xlu2 %1025 }
 0x3e0   : > { %v1022_v5 = vpop.permute.xlu1 %1021 }
 0x3e1   : > { %v1018_v3 = vpop.permute.xlu0 %1017 }
 0x3e2   : > { %v1028_v9 = vsel %vm651_vm2, %v1009_v0, %v1018_v3 }
 0x3e3   : > { %v1030_v13 = vsel %vm1029_vm7, %v1028_v9, %v1022_v5 }
 0x3e4   : > { %v1032_v14 = vsel %vm1031_vm8, %v1030_v13, %v1026_v10 }
 0x3e5   : > { %v1033_v15 = vpack.c.bf16 %v1032_v14, %v1032_v14 }
 0x3e7   : > { %1213 = vmatmul.msk.bf16.vlgmr.msra.gmra.mxu1 %vm267_vm0, %v1033_v15 }
 0x464   : > { %v1066_v17 = vpop.f32.mrf.mxu1 }
 0x465   : > { %v1067_v18 = vadd.f32 %v1301_v16, %v1066_v17 }
 0x467   : > { %1070 = vst.msk [vmem:[%s247_s28] sm:$0xff] %vm267_vm0, %v1067_v18 }
 0x468   : > { %1435 = shalt.err (!%p1432_p9)
}
 0x469   : > { %1232 = dma.vmem_to_hbm [thread:$0]  (%p1588_p4), %s1085_s23, 128, %s1087_s13, %s1072_s22  }
 0x46c   : > { %v1068_v19 = vpop.f32.mrf.mxu1 }
 0x46d PF: > { %s1098_s14 = sand.u32 1, %s1466_s15   ;;  %p1878_p10 = scmp.ge.s32.totalorder %s1478_s18, 2 }
 0x46e   : > { %s1099_s10 = scalar_lea.sflag [#allocation4], %s1098_s14 }
 0x46f   : > { %p1246_p13 = pnand %p1878_p10, %p1592_p6 }
 0x471   : > { %p1247_p11 = pneg %p1246_p13 }
 0x473   : > { %1461 = dma.done.wait (%p1247_p11), %s1099_s10, 128  }
 0x474   : > { %1463 = vsyncadd (%p1247_p11), %s1099_s10, 4294967168  ;;  %p18_p0 = scmp.ge.s32.totalorder %s1562_s8, 4   ;;  %s1879_s15 = smov %s1470_s16 }
 0x475   : > { %s1880_s16 = smov %s1474_s17  ;;  %s1881_s17 = smov %s1573_s11 }
 0x476   : > { %s1882_s18 = smov %s1562_s8  ;;  %20 = sbr.rel (!%p18_p0) target bundleno = 6 (0x6), region = 89 }
 0x47b   :  { %1105 = vsyncpa [#allocation3], 1 }
 0x47c   :  { %1107 = vsyncpa [#allocation3 + $0x1], 1 }
 0x47d   :  { %1108 = vsyncpa [#allocation6], 1 }
 0x47e   :  { %1109 = vsyncpa [#allocation4], 1 }
 0x47f   :  { %1111 = vsyncpa [#allocation4 + $0x1], 1 }

// kernel: tpu_custom_call.1
= control target key start
LH: loop header
LB: loop body
LE: loop exit
PB: predicated region body
PF: predicated region fallthrough
CT: control target
= control target key end

     0   :  { %9 = vsyncpa [#allocation3], 0  ;;  %s1867_s0 = inlined_call_operand.hbm [shape: f32[2,8,32], index: 0, kind: input, shape index: {}]   ;;  %s1868_s1 = inlined_call_operand.hbm [shape: bf16[32,96], index: 1, kind: input, shape index: {}]   ;;  %s1869_s2 = inlined_call_operand.hbm [shape: bf16[32,32], index: 2, kind: input, shape index: {}]   ;;  %s1870_s3 = inlined_call_operand.vmem [shape: f32[1,32], index: 3, kind: input, shape index: {}]   ;;  %s1871_s4 = inlined_call_operand.hbm [shape: f32[2,8,32], index: 4, kind: output, shape index: {}]  }
   0x1   :  { %11 = vsyncpa [#allocation3 + $0x1], 0 }
   0x2   :  { %12 = vsyncpa [#allocation6], 0 }
   0x3   :  { %13 = vsyncpa [#allocation4], 0 }
   0x4   :  { %15 = vsyncpa [#allocation4 + $0x1], 0  ;;  %s1519_s15 = smov 0   ;;  %s1521_s16 = smov 0  }
   0x5   :  { %s1523_s17 = smov 0   ;;  %s1525_s18 = smov 0  }
   0x6 LB: > { %s152_s21 = sshll.u32 %s1868_s1, 4  ;;  %s1543_s22 = sadd.s32 4294967295, %s1478_s18   ;;  %s1478_s18 = sphi %s1525_s18, %s1882_s18   ;;  %s1474_s17 = sphi %s1523_s17, %s1881_s17   ;;  %s1470_s16 = sphi %s1521_s16, %s1880_s16   ;;  %s1466_s15 = sphi %s1519_s15, %s1879_s15   ;;  %s153_s21 = int_to_ptr.hbm [resolvable:$true] %s152_s21 }
   0x7   : > { %p1177_p0 = scmp.ge.s32.totalorder %s1478_s18, 1  ;;  %p42_p1 = scmp.eq.s32.totalorder %s1543_s22, 0 }
   0x8   : > { %p141_p2 = scmp.lt.s32.totalorder %s1478_s18, 3  ;;  %s1480_s24 = smov [#allocation5]  }
   0x9   : > { %s154_s25 = sshll.u32 %s1480_s24, 4  ;;  %s166_s28 = sshll.u32 %s1869_s2, 4  ;;  %s155_s25 = int_to_ptr.vmem [resolvable:$true] %s154_s25  ;;  %s167_s28 = int_to_ptr.hbm [resolvable:$true] %s166_s28 }
   0xa   : > { %p1548_p3 = pnand %p1177_p0, %p141_p2  ;;  %s1481_s29 = smov [#allocation7]  }
   0xb   : > { %s168_s30 = sshll.u32 %s1481_s29, 4  ;;  %s1482_s5 = smov 64   ;;  %s169_s30 = int_to_ptr.vmem [resolvable:$true] %s168_s30 }
   0xc   : > { %p1234_p4 = pneg %p1548_p3  ;;  %s1483_s6 = smov 4  }
   0xd   : > { %s1176_s7 = sadd.s32 4294967294, %s1478_s18   ;;  %s1562_s8 = sadd.s32 1, %s1478_s18  }
   0xe   : > { %p1235_p6 = pnand %p1234_p4, %p42_p1  ;;  %s25_s9 = ssub.s32 %s1478_s18, %s1562_s8 }
   0xf   : > { %s28_s10 = sadd.s32 1, %s1474_s17  ;;  %p26_p7 = scmp.eq.s32.totalorder %s25_s9, 0 }
  0x10   : > { %1237 = dma.hbm_to_vmem [thread:$0]  (!%p1235_p6), %s153_s21, 256, %s155_s25, [#allocation6], %s1482_s5, %s1482_s5, %s1483_s6  }
  0x11   : > { %1240 = dma.hbm_to_vmem [thread:$0]  (!%p1235_p6), %s167_s28, 256, %s169_s30, [#allocation6], %s1482_s5, %s1482_s5, %s1483_s6  }
  0x12   : > { %p35_p8 = scmp.ne.s32.totalorder %s1474_s17, %s1470_s16  ;;  %p36_p9 = scmp.eq.s32.totalorder %s1478_s18, 0 }
  0x13   : > { %p41_p10 = scmp.ne.s32.totalorder %s1470_s16, %s1466_s15  ;;  %p128_p13 = scmp.eq.s32.totalorder %s1543_s22, 1 }
  0x14   : > { %s1573_s11 = scalar_select %p26_p7, %s1474_s17, %s28_s10  }
  0x15   : > { %p1575_p11 = por %p36_p9, %p35_p8  ;;  %p1581_p12 = por %p42_p1, %p41_p10 }
  0x16   : > { %p134_p0 = scmp.eq.s32.totalorder %s1176_s7, 1  ;;  %p1251_p2 = scmp.lt.s32.totalorder %s1478_s18, 2 }
  0x17   : > { %s185_s14 = sand.u32 1, %s1474_s17   ;;  %p1588_p4 = por %p128_p13, %p35_p8 }
  0x18   : > { %p1592_p6 = por %p134_p0, %p41_p10  ;;  %s1181_s21 = sshll.u32 %s185_s14, 3 }
  0x19   : > { %s1182_s24 = sshll.u32 %s1478_s18, 3  ;;  %s189_s28 = scalar_lea.vmem [#allocation2], %s1181_s21 }
  0x1a   : > { %s193_s27 = scalar_lea.hbm %s1867_s0, %s1182_s24  ;;  %s197_s29 = sshll.u32 %s189_s28, 4  ;;  %s198_s29 = int_to_ptr.vmem [resolvable:$true] %s197_s29 }
  0x1b   : > { %s195_s30 = sshll.u32 %s193_s27, 4  ;;  %p1602_p7 = pnand %p1251_p2, %p1575_p11  ;;  %s196_s30 = int_to_ptr.hbm [resolvable:$true] %s195_s30 }
  0x1c   : > { %s186_s6 = scalar_lea.sflag [#allocation3], %s185_s14  ;;  %s1378_s7 = sshra.s32 %s196_s30, 4  ;;  %s1379_s7 = int_to_ptr.hbm [resolvable:$true] %s1378_s7 }
  0x1d   : > { %s1380_s9 = scalar_lea.hbm %s1379_s7, 8  ;;  %p1382_p9 = pneg %p1602_p7 }
  0x1e   : > { %p1381_p8 = scmp.ne.s32.totalorder %s1379_s7, %s1380_s9  ;;  %s1385_s24 = scalar_lea.hbm %s1867_s0, 16 }
  0x1f   : > { %p1386_p11 = scmp.lt.s32.totalorder %s1379_s7, %s1867_s0  ;;  %p1387_p0 = scmp.lt.s32.totalorder %s1385_s24, %s1380_s9 }
  0x20   : > { %p1383_p10 = pnand %p1382_p9, %p1381_p8 }
  0x21   : > { %p1388_p2 = por %p1387_p0, %p1386_p11 }
  0x22   : > { %p1384_p13 = pneg %p1383_p10 }
  0x24   : > { %p1389_p5 = pnand %p1388_p2, %p1384_p13 }
  0x26   : > { %1392 = shalt.err (!%p1389_p5)
}
  0x27   : > { %1244 = dma.hbm_to_vmem [thread:$0]  (!%p1602_p7), %s196_s30, 128, %s198_s29, %s186_s6  }
  0x28   : > { %206 = sbr.rel (%p1548_p3) target bundleno = 1133 (0x46d), region = 36  ;;  %s1619_s14 = sand.u32 (!%p1548_p3), 1, %s1470_s16  }
  0x29   : > { %s1184_s26 = sshll.u32 (!%p1548_p3), %s1619_s14, 3  ;;  %s209_s27 = scalar_lea.sflag (!%p1548_p3), [#allocation3], %s1619_s14 }
  0x2a   : > { %s212_s28 = scalar_lea.vmem (!%p1548_p3), [#allocation2], %s1184_s26 }
  0x2d   : > { %1453 = dma.done.wait (%p1581_p12), %s209_s27, 128  }
  0x2e   : > { %1455 = vsyncadd (%p1581_p12), %s209_s27, 4294967168 }
  0x2f   : > { %1457 = dma.done.wait (%p42_p1), [#allocation6], 512  }
  0x30   : > { %1459 = vsyncadd (%p42_p1), [#allocation6], 4294966784  ;;  %v1219_v0 = vld [vmem:[#allocation5 + $0x8] sm:$0xff]  ;;  %v1218_v1 = vld [vmem:[#allocation5] sm:$0xff]  ;;  %vm267_vm0 = vcmask 261120   ;;  %s1484_s23 = smov 104  }
  0x31   : > { %277 = vmatpush.bf16.msra.mxu0 %v1219_v0  ;;  %v249_v2 = vld [vmem:[%s212_s28] sm:$0xff]  ;;  %s1485_s13 = smov 120   ;;  %s1486_s29 = smov 96   ;;  %v1489_v7 = vmov 1983009808   ;;  %vm315_vm1 = vcmask 1047556  }
  0x32   : > { %v250_v3 = vpack.c.bf16 %v249_v2, %v249_v2  ;;  %s1487_s30 = smov 112   ;;  %s1488_s5 = smov 64   ;;  %v306_v8 = vunpack.c.l.s4 %v1489_v7  ;;  %v1490_v16 = vmov 1934713408   ;;  %vm651_vm2 = vcmask 64512  }
  0x33   : > { %v320_v17 = vunpack.c.l.s4 %v1490_v16  ;;  %vm771_vm3 = vcmask 1043456   ;;  %s1491_s6 = smov 24   ;;  %s1492_s7 = smov 16  }
  0x34   : > { %v1636_v12 = vunpack.c.0.s8 %v306_v8  ;;  %s1493_s9 = smov 8   ;;  %s1215_s10 = sshll.u32 %s1543_s22, 3 }
  0x35   : > { %278 = vmatpush.bf16.msra.mxu0 %v1218_v1  ;;  %v1641_v24 = vunpack.c.0.s8 %v320_v17  ;;  %s1082_s25 = scalar_lea.hbm %s1871_s4, %s1215_s10  ;;  %s247_s28 = scalar_lea.vmem [#allocation8], %s1184_s26 }
  0x36   : > { %s1072_s22 = scalar_lea.sflag [#allocation4], %s1619_s14  ;;  %s1428_s26 = scalar_lea.hbm %s1871_s4, 16 }
  0x38   : > { %1196 = vmatmul.msk.bf16.vlgmr.msra.gmra.mxu0 %vm267_vm0, %v250_v3 }
  0xb5   : > { %v280_v4 = vpop.f32.mrf.mxu0 }
  0xb6   : > { %v284_v5 = vpack.c.bf16 %v280_v4, %v280_v4 }
  0xb8   : > { %290 = vrot.lane.b32.xlu1 %v284_v5, %s1484_s23  ;;  %286 = vrot.lane.b32.xlu0 %v284_v5, %s1485_s13  ;;  %v295_v14 = vshrl.u32 %v284_v5, 16  ;;  %s1084_s23 = sshll.u32 %s247_s28, 4  ;;  %s1086_s13 = sshll.u32 %s1082_s25, 4  ;;  %s1085_s23 = int_to_ptr.vmem [resolvable:$true] %s1084_s23  ;;  %s1087_s13 = int_to_ptr.hbm [resolvable:$true] %s1086_s13 }
  0xbd   : > { %v282_v6 = vpop.f32.mrf.mxu0 }
  0xc0   : > { %407 = vrot.lane.b32.xlu1 %v284_v5, %s1486_s29  ;;  %288 = vrot.lane.b32.xlu0 %v284_v5, %s1487_s30 }
  0xc8   : > { %529 = vrot.lane.b32.xlu1 %v284_v5, %s1488_s5 }
 0x12a   : > { %v291_v9 = vpop.permute.xlu1 %290  ;;  %v287_v10 = vpop.permute.xlu0 %286 }
 0x12b   : > { %v296_v11 = vshrl.u32 %v287_v10, 16  ;;  %535 = vrot.lane.b32.xlu1 %v291_v9, %s1488_s5  ;;  %413 = vrot.lane.b32.xlu0 %v291_v9, %s1486_s29  ;;  %v294_v13 = vpack.i.b16 %v287_v10, %v284_v5  ;;  %v302_v20 = vshrl.u32 %v291_v9, 16 }
 0x12c   : > { %409 = vrot.lane.b32.xlu2 %v287_v10, %s1486_s29 }
 0x12d   : > { %v297_v15 = vpack.i.b16 %v296_v11, %v295_v14  ;;  %v308_v18 = vperm.slane %v294_v13, %v1636_v12 }
 0x12f   : > { %v335_v21 = vperm.slane %v297_v15, %v1636_v12  ;;  %v317_v25 = vrot.slane %v308_v18, 4 }
 0x131   : > { %v343_v28 = vrot.slane %v335_v21, 4 }
 0x132   : > { %v289_v19 = vpop.permute.xlu0 %288  ;;  %v408_v15 = vpop.permute.xlu1 %407 }
 0x133   : > { %v300_v22 = vpack.i.b16 %v291_v9, %v289_v19  ;;  %v301_v23 = vshrl.u32 %v289_v19, 16  ;;  %533 = vrot.lane.b32.xlu0 %v289_v19, %s1488_s5  ;;  %v418_v17 = vshrl.u32 %v408_v15, 16 }
 0x134   : > { %411 = vrot.lane.b32.xlu2 %v289_v19, %s1486_s29  ;;  %s1422_s29 = sshra.s32 %s1087_s13, 4  ;;  %s1423_s29 = int_to_ptr.hbm [resolvable:$true] %s1422_s29 }
 0x135   : > { %v303_v26 = vpack.i.b16 %v302_v20, %v301_v23  ;;  %v313_v27 = vperm.slane %v300_v22, %v1636_v12  ;;  %s1424_s30 = scalar_lea.hbm %s1423_s29, 8  ;;  %p1429_p12 = scmp.lt.s32.totalorder %s1423_s29, %s1871_s4 }
 0x136   : > { %p1425_p1 = scmp.ne.s32.totalorder %s1423_s29, %s1424_s30  ;;  %p1430_p7 = scmp.lt.s32.totalorder %s1428_s26, %s1424_s30 }
 0x137   : > { %v314_v29 = vrot.slane %v313_v27, 4  ;;  %v318_v30 = vsel %vm315_vm1, %v313_v27, %v317_v25  ;;  %v340_v31 = vperm.slane %v303_v26, %v1636_v12 }
 0x138   : > { %v326_v32 = vperm.slane %v318_v30, %v1641_v24  ;;  %p1426_p3 = pnand %p1425_p1, %p1588_p4  ;;  %p1431_p8 = por %p1430_p7, %p1429_p12 }
 0x139   : > { %v316_v33 = vsel %vm315_vm1, %v314_v29, %v308_v18  ;;  %v341_v34 = vrot.slane %v340_v31, 4  ;;  %v344_v35 = vsel %vm315_vm1, %v340_v31, %v343_v28 }
 0x13a   : > { %v322_v36 = vperm.slane %v316_v33, %v1641_v24  ;;  %v329_v37 = vrot.slane %v326_v32, 4  ;;  %v352_v38 = vperm.slane %v344_v35, %v1641_v24  ;;  %p1427_p5 = pneg %p1426_p3 }
 0x13b   : > { %v342_v39 = vsel %vm315_vm1, %v341_v34, %v335_v21  ;;  %v530_v21 = vpop.permute.xlu1 %529 }
 0x13c   : > { %v327_v40 = vrot.slane %v322_v36, 4  ;;  %v330_v41 = vsel %vm315_vm1, 0, %v329_v37  ;;  %v348_v42 = vperm.slane %v342_v39, %v1641_v24  ;;  %v355_v43 = vrot.slane %v352_v38, 4  ;;  %531 = vrot.lane.b32.xlu2 %v287_v10, %s1488_s5  ;;  %p1432_p9 = pnand %p1431_p8, %p1427_p5 }
 0x13d   : > { %v362_v44 = vrot.slane %v330_v41, 4  ;;  %v357_v45 = vsel %vm315_vm1, %v329_v37, %v322_v36  ;;  %v540_v30 = vshrl.u32 %v530_v21, 16 }
 0x13e   : > { %v353_v46 = vrot.slane %v348_v42, 4  ;;  %v356_v47 = vsel %vm315_vm1, 0, %v355_v43  ;;  %v328_v48 = vsel %vm315_vm1, 0, %v327_v40  ;;  %v376_v51 = vsel %vm315_vm1, %v355_v43, %v348_v42 }
 0x13f   : > { %v381_v49 = vrot.slane %v356_v47, 4  ;;  %v363_v50 = vsel %vm315_vm1, %v362_v44, %v328_v48  ;;  %v361_v55 = vperm.slane %v357_v45, %v1636_v12  ;;  %v380_v59 = vperm.slane %v376_v51, %v1636_v12 }
 0x140   : > { %v354_v52 = vsel %vm315_vm1, 0, %v353_v46  ;;  %v367_v53 = vperm.slane %v363_v50, %v1636_v12 }
 0x141   : > { %v382_v54 = vsel %vm315_vm1, %v381_v49, %v354_v52 }
 0x142   : > { %v368_v56 = vrot.slane %v367_v53, 4  ;;  %v386_v57 = vperm.slane %v382_v54, %v1636_v12 }
 0x144   : > { %v369_v58 = vsel %vm315_vm1, %v368_v56, %v361_v55  ;;  %v387_v60 = vrot.slane %v386_v57, 4 }
 0x145   : > { %v1668_v61 = vperm.slane %v369_v58, %v1641_v24 }
 0x146   : > { %v388_v62 = vsel %vm315_vm1, %v387_v60, %v380_v59 }
 0x147   : > { %v1672_v63 = vperm.slane %v388_v62, %v1641_v24  ;;  %v374_v0 = vrot.slane %v1668_v61, 4  ;;  %v398_v1 = vshrl.u32 %v1668_v61, 16 }
 0x149   : > { %v397_v2 = vpack.i.b16 %v1672_v63, %v1668_v61  ;;  %v399_v3 = vshrl.u32 %v1672_v63, 16  ;;  %v1680_v4 = vsel %vm315_vm1, 0, %v374_v0  ;;  %v393_v5 = vrot.slane %v1672_v63, 4 }
 0x14a   : > { %v404_v9 = vshrl.u32 %v1680_v4, 16 }
 0x14b   : > { %v1683_v6 = vpack.i.b16 %v399_v3, %v398_v1  ;;  %v1686_v7 = vsel %vm315_vm1, 0, %v393_v5 }
 0x14c   : > { %v403_v8 = vpack.i.b16 %v1686_v7, %v1680_v4  ;;  %v405_v10 = vshrl.u32 %v1686_v7, 16 }
 0x14e   : > { %v1692_v11 = vpack.i.b16 %v405_v10, %v404_v9 }
 0x186   : > { %v410_v13 = vpop.permute.xlu2 %409 }
 0x187   : > { %v419_v16 = vshrl.u32 %v410_v13, 16  ;;  %v417_v18 = vpack.i.b16 %v410_v13, %v408_v15 }
 0x189   : > { %v420_v19 = vpack.i.b16 %v419_v16, %v418_v17  ;;  %v431_v22 = vperm.slane %v417_v18, %v1636_v12 }
 0x18b   : > { %v457_v26 = vperm.slane %v420_v19, %v1636_v12  ;;  %v439_v31 = vrot.slane %v431_v22, 4 }
 0x18d   : > { %v465_v36 = vrot.slane %v457_v26, 4 }
 0x18e   : > { %v412_v14 = vpop.permute.xlu2 %411 }
 0x18f   : > { %v424_v27 = vshrl.u32 %v412_v14, 16 }
 0x196   : > { %v532_v20 = vpop.permute.xlu2 %531 }
 0x197   : > { %v541_v23 = vshrl.u32 %v532_v20, 16  ;;  %v539_v32 = vpack.i.b16 %v532_v20, %v530_v21 }
 0x199   : > { %v542_v35 = vpack.i.b16 %v541_v23, %v540_v30  ;;  %v553_v42 = vperm.slane %v539_v32, %v1636_v12 }
 0x19b   : > { %v579_v46 = vperm.slane %v542_v35, %v1636_v12  ;;  %v561_v59 = vrot.slane %v553_v42, 4 }
 0x19d   : > { %v414_v25 = vpop.permute.xlu0 %413  ;;  %v536_v40 = vpop.permute.xlu1 %535  ;;  %v587_v1 = vrot.slane %v579_v46, 4 }
 0x19e   : > { %v423_v28 = vpack.i.b16 %v414_v25, %v412_v14  ;;  %v425_v29 = vshrl.u32 %v414_v25, 16  ;;  %v547_v51 = vshrl.u32 %v536_v40, 16 }
 0x1a0   : > { %v426_v33 = vpack.i.b16 %v425_v29, %v424_v27  ;;  %v436_v34 = vperm.slane %v423_v28, %v1636_v12 }
 0x1a2   : > { %v437_v37 = vrot.slane %v436_v34, 4  ;;  %v440_v38 = vsel %vm315_vm1, %v436_v34, %v439_v31  ;;  %v462_v39 = vperm.slane %v426_v33, %v1636_v12 }
 0x1a3   : > { %v448_v41 = vperm.slane %v440_v38, %v1641_v24 }
 0x1a4   : > { %v438_v43 = vsel %vm315_vm1, %v437_v37, %v431_v22  ;;  %v463_v44 = vrot.slane %v462_v39, 4  ;;  %v466_v45 = vsel %vm315_vm1, %v462_v39, %v465_v36 }
 0x1a5   : > { %v444_v47 = vperm.slane %v438_v43, %v1641_v24  ;;  %v451_v48 = vrot.slane %v448_v41, 4  ;;  %v474_v49 = vperm.slane %v466_v45, %v1641_v24  ;;  %v534_v50 = vpop.permute.xlu0 %533 }
 0x1a6   : > { %v464_v52 = vsel %vm315_vm1, %v463_v44, %v457_v26  ;;  %v545_v53 = vpack.i.b16 %v536_v40, %v534_v50  ;;  %v546_v54 = vshrl.u32 %v534_v50, 16 }
 0x1a7   : > { %v449_v55 = vrot.slane %v444_v47, 4  ;;  %v452_v56 = vsel %vm315_vm1, 0, %v451_v48  ;;  %v470_v57 = vperm.slane %v464_v52, %v1641_v24  ;;  %v477_v58 = vrot.slane %v474_v49, 4 }
 0x1a8   : > { %v484_v60 = vrot.slane %v452_v56, 4  ;;  %v548_v62 = vpack.i.b16 %v547_v51, %v546_v54  ;;  %v558_v0 = vperm.slane %v545_v53, %v1636_v12  ;;  %v479_v18 = vsel %vm315_vm1, %v451_v48, %v444_v47 }
 0x1a9   : > { %v450_v3 = vsel %vm315_vm1, 0, %v449_v55  ;;  %v475_v5 = vrot.slane %v470_v57, 4  ;;  %v478_v9 = vsel %vm315_vm1, 0, %v477_v58  ;;  %v498_v28 = vsel %vm315_vm1, %v477_v58, %v470_v57 }
 0x1aa   : > { %v503_v10 = vrot.slane %v478_v9, 4  ;;  %v559_v13 = vrot.slane %v558_v0, 4  ;;  %v562_v14 = vsel %vm315_vm1, %v558_v0, %v561_v59  ;;  %v584_v15 = vperm.slane %v548_v62, %v1636_v12 }
 0x1ab   : > { %v570_v16 = vperm.slane %v562_v14, %v1641_v24  ;;  %v476_v17 = vsel %vm315_vm1, 0, %v475_v5  ;;  %v485_v19 = vsel %vm315_vm1, %v484_v60, %v450_v3  ;;  %v483_v30 = vperm.slane %v479_v18, %v1636_v12 }
 0x1ac   : > { %v560_v20 = vsel %vm315_vm1, %v559_v13, %v553_v42  ;;  %v585_v21 = vrot.slane %v584_v15, 4  ;;  %v588_v22 = vsel %vm315_vm1, %v584_v15, %v587_v1  ;;  %v489_v23 = vperm.slane %v485_v19, %v1636_v12 }
 0x1ad   : > { %v566_v25 = vperm.slane %v560_v20, %v1641_v24  ;;  %v573_v26 = vrot.slane %v570_v16, 4  ;;  %v596_v27 = vperm.slane %v588_v22, %v1641_v24  ;;  %v504_v32 = vsel %vm315_vm1, %v503_v10, %v476_v17 }
 0x1ae   : > { %v586_v29 = vsel %vm315_vm1, %v585_v21, %v579_v46  ;;  %v490_v31 = vrot.slane %v489_v23, 4  ;;  %v502_v39 = vperm.slane %v498_v28, %v1636_v12  ;;  %v508_v40 = vperm.slane %v504_v32, %v1636_v12 }
 0x1af   : > { %v571_v33 = vrot.slane %v566_v25, 4  ;;  %v574_v34 = vsel %vm315_vm1, 0, %v573_v26  ;;  %v592_v35 = vperm.slane %v586_v29, %v1641_v24  ;;  %v599_v36 = vrot.slane %v596_v27, 4 }
 0x1b0   : > { %v606_v37 = vrot.slane %v574_v34, 4  ;;  %v491_v38 = vsel %vm315_vm1, %v490_v31, %v483_v30  ;;  %v509_v46 = vrot.slane %v508_v40, 4  ;;  %v601_v47 = vsel %vm315_vm1, %v573_v26, %v566_v25 }
 0x1b1   : > { %v572_v41 = vsel %vm315_vm1, 0, %v571_v33  ;;  %v597_v42 = vrot.slane %v592_v35, 4  ;;  %v600_v43 = vsel %vm315_vm1, 0, %v599_v36  ;;  %v495_v44 = vperm.slane %v491_v38, %v1641_v24 }
 0x1b2   : > { %v625_v45 = vrot.slane %v600_v43, 4  ;;  %v607_v48 = vsel %vm315_vm1, %v606_v37, %v572_v41  ;;  %v510_v52 = vsel %vm315_vm1, %v509_v46, %v502_v39  ;;  %v605_v55 = vperm.slane %v601_v47, %v1636_v12 }
 0x1b3   : > { %v496_v49 = vrot.slane %v495_v44, 4  ;;  %v598_v50 = vsel %vm315_vm1, 0, %v597_v42  ;;  %v611_v51 = vperm.slane %v607_v48, %v1636_v12  ;;  %v514_v54 = vperm.slane %v510_v52, %v1641_v24 }
 0x1b4   : > { %v626_v53 = vsel %vm315_vm1, %v625_v45, %v598_v50  ;;  %v620_v57 = vsel %vm315_vm1, %v599_v36, %v592_v35  ;;  %v520_v58 = vshrl.u32 %v495_v44, 16 }
 0x1b5   : > { %v612_v56 = vrot.slane %v611_v51, 4  ;;  %v497_v59 = vsel %vm315_vm1, 0, %v496_v49  ;;  %v630_v60 = vperm.slane %v626_v53, %v1636_v12  ;;  %v519_v62 = vpack.i.b16 %v514_v54, %v495_v44 }
 0x1b6   : > { %v521_v0 = vshrl.u32 %v514_v54, 16  ;;  %v515_v1 = vrot.slane %v514_v54, 4  ;;  %v624_v9 = vperm.slane %v620_v57, %v1636_v12  ;;  %v526_v17 = vshrl.u32 %v497_v59, 16 }
 0x1b7   : > { %v613_v3 = vsel %vm315_vm1, %v612_v56, %v605_v55  ;;  %v631_v10 = vrot.slane %v630_v60, 4  ;;  %v656_v13 = vsel %vm651_vm2, %v519_v62, 0 }
 0x1b8   : > { %v617_v5 = vperm.slane %v613_v3, %v1641_v24  ;;  %v522_v14 = vpack.i.b16 %v521_v0, %v520_v58  ;;  %v516_v15 = vsel %vm315_vm1, 0, %v515_v1  ;;  %665 = vmatpush.bf16.xpose.msra.mxu1 %v656_v13 }
 0x1b9   : > { %v525_v16 = vpack.i.b16 %v516_v15, %v497_v59  ;;  %v527_v18 = vshrl.u32 %v516_v15, 16  ;;  %v632_v19 = vsel %vm315_vm1, %v631_v10, %v624_v9 }
 0x1ba   : > { %v675_v20 = vsel %vm651_vm2, %v522_v14, 0  ;;  %v636_v21 = vperm.slane %v632_v19, %v1641_v24  ;;  %v618_v22 = vrot.slane %v617_v5, 4  ;;  %v642_v26 = vshrl.u32 %v617_v5, 16 }
 0x1bb   : > { %684 = vmatpush.bf16.xpose.msra.mxu2 %v675_v20  ;;  %v694_v23 = vsel %vm651_vm2, %v525_v16, 0  ;;  %v528_v25 = vpack.i.b16 %v527_v18, %v526_v17 }
 0x1bc   : > { %703 = vmatpush.bf16.xpose.msra.mxu3 %v694_v23  ;;  %v641_v27 = vpack.i.b16 %v636_v21, %v617_v5  ;;  %v643_v28 = vshrl.u32 %v636_v21, 16  ;;  %v619_v29 = vsel %vm315_vm1, 0, %v618_v22  ;;  %v637_v30 = vrot.slane %v636_v21, 4 }
 0x1bd   : > { %v713_v31 = vsel %vm651_vm2, %v528_v25, 0  ;;  %v648_v36 = vshrl.u32 %v619_v29, 16 }
 0x1be   : > { %722 = vmatpush.bf16.xpose.msrb.mxu0 %v713_v31  ;;  %v773_v32 = vsel %vm771_vm3, %v641_v27, 0  ;;  %v644_v33 = vpack.i.b16 %v643_v28, %v642_v26  ;;  %v638_v34 = vsel %vm315_vm1, 0, %v637_v30 }
 0x1bf   : > { %v647_v35 = vpack.i.b16 %v638_v34, %v619_v29  ;;  %v649_v37 = vshrl.u32 %v638_v34, 16  ;;  %1197 = vmatmul.msk.bf16.vlgmr.msra.gmra.mxu1 %vm651_vm2, %v397_v2 }
 0x1c0   : > { %782 = vmatpush.bf16.msrb.mxu1 %v773_v32  ;;  %v792_v38 = vsel %vm771_vm3, %v644_v33, 0 }
 0x1c1   : > { %v811_v39 = vsel %vm771_vm3, %v647_v35, 0  ;;  %v650_v40 = vpack.i.b16 %v649_v37, %v648_v36 }
 0x1c2   : > { %1198 = vmatmul.msk.bf16.vlgmr.msra.gmra.mxu2 %vm651_vm2, %v1683_v6 }
 0x1c3   : > { %801 = vmatpush.bf16.msrb.mxu2 %v792_v38  ;;  %1199 = vmatmul.msk.bf16.vlgmr.msra.gmra.mxu3 %vm651_vm2, %v403_v8  ;;  %v830_v41 = vsel %vm771_vm3, %v650_v40, 0 }
 0x1c4   : > { %820 = vmatpush.bf16.msrb.mxu3 %v811_v39 }
 0x1c5   : > { %1200 = vmatmul.msk.bf16.vlgmr.msrb.gmra.mxu0 %vm651_vm2, %v1692_v11 }
 0x1c6   : > { %839 = vmatpush.bf16.msra.mxu0 %v830_v41 }
 0x23c   : > { %v667_v61 = vpop.f32.mrf.mxu1 }
 0x23d   : > { %v728_v63 = vsel %vm651_vm2, %v667_v61, -inf }
 0x23e   : > { %729 = vmax.xlane.f32.xlu1 %v728_v63 }
 0x242   : > { %v724_v2 = vpop.f32.mrf.mxu0 }
 0x243   : > { %v737_v46 = vsel %vm651_vm2, %v724_v2, -inf }
 0x244   : > { %v669_v42 = vpop.f32.mrf.mxu1 }
 0x245   : > { %v686_v43 = vpop.f32.mrf.mxu2 }
 0x246   : > { %v705_v6 = vpop.f32.mrf.mxu3  ;;  %v731_v44 = vsel %vm651_vm2, %v686_v43, -inf }
 0x247   : > { %732 = vmax.xlane.f32.xlu0 %v731_v44  ;;  %v734_v4 = vsel %vm651_vm2, %v705_v6, -inf }
 0x248   : > { %735 = vmax.xlane.f32.xlu2 %v734_v4 }
 0x24a   : > { %v726_v7 = vpop.f32.mrf.mxu0 }
 0x24d   : > { %v688_v8 = vpop.f32.mrf.mxu2 }
 0x24e   : > { %v707_v45 = vpop.f32.mrf.mxu3 }
 0x250   : > { %738 = vmax.xlane.f32.xlu2 %v737_v46 }
 0x2b1   : > { %v730_v11 = vpop.xlane.xlu1 %729 }
 0x2b2   : > { %v740_v47 = vsub.f32 %v667_v61, %v730_v11 }
 0x2b4   : > { %v744_v48 = vmul.f32 1.442695, %v740_v47 }
 0x2b6   : > { %1302 = vpow2.f32 %v744_v48 }
 0x2ba   : > { %v733_v49 = vpop.xlane.xlu0 %732 }
 0x2bb   : > { %v741_v50 = vsub.f32 %v686_v43, %v733_v49  ;;  %v736_v51 = vpop.xlane.xlu2 %735 }
 0x2bc   : > { %v742_v52 = vsub.f32 %v705_v6, %v736_v51  ;;  %v1303_v53 = vpop.eup %1302 }
 0x2bd   : > { %v746_v54 = vmul.f32 1.442695, %v741_v50  ;;  %v752_v56 = vsel %vm651_vm2, %v1303_v53, 0.0  ;;  %v764_v57 = vpack.c.bf16 %v1303_v53, %v1303_v53 }
 0x2be   : > { %v748_v55 = vmul.f32 1.442695, %v742_v52  ;;  %753 = vadd.xlane.f32.xlu0 %v752_v56 }
 0x2bf   : > { %1304 = vpow2.f32 %v746_v54  ;;  %1201 = vmatmul.msk.bf16.vlgmr.msrb.gmra.mxu1 %vm651_vm2, %v764_v57 }
 0x2c0   : > { %1306 = vpow2.f32 %v748_v55 }
 0x2c3   : > { %v739_v58 = vpop.xlane.xlu2 %738 }
 0x2c4   : > { %v743_v59 = vsub.f32 %v724_v2, %v739_v58 }
 0x2c5   : > { %v1305_v60 = vpop.eup %1304 }
 0x2c6   : > { %v1307_v62 = vpop.eup %1306  ;;  %v750_v0 = vmul.f32 1.442695, %v743_v59  ;;  %v765_v1 = vpack.c.bf16 %v1305_v60, %v1305_v60  ;;  %v755_v13 = vsel %vm651_vm2, %v1305_v60, 0.0 }
 0x2c7   : > { %v758_v3 = vsel %vm651_vm2, %v1307_v62, 0.0  ;;  %v766_v5 = vpack.c.bf16 %v1307_v62, %v1307_v62 }
 0x2c8   : > { %1308 = vpow2.f32 %v750_v0  ;;  %1202 = vmatmul.msk.bf16.vlgmr.msrb.gmra.mxu2 %vm651_vm2, %v765_v1  ;;  %759 = vadd.xlane.f32.xlu2 %v758_v3 }
 0x2c9   : > { %1203 = vmatmul.msk.bf16.vlgmr.msrb.gmra.mxu3 %vm651_vm2, %v766_v5 }
 0x2ce   : > { %v1309_v9 = vpop.eup %1308 }
 0x2cf   : > { %v767_v10 = vpack.c.bf16 %v1309_v9, %v1309_v9  ;;  %v761_v14 = vsel %vm651_vm2, %v1309_v9, 0.0 }
 0x2d0   : > { %756 = vadd.xlane.f32.xlu2 %v755_v13  ;;  %762 = vadd.xlane.f32.xlu1 %v761_v14 }
 0x2d1   : > { %1204 = vmatmul.msk.bf16.vlgmr.msra.gmra.mxu0 %vm651_vm2, %v767_v10 }
 0x331   : > { %v754_v15 = vpop.xlane.xlu0 %753 }
 0x332   : > { %1310 = vrcp.f32 %v754_v15  ;;  %v856_v29 = vand.u32 2147483648, %v754_v15  ;;  %vm850_vm5 = vweird.f32 %v754_v15  ;;  %v854_v31 = vand.u32 2147483647, %v754_v15 }
 0x334   : > { %v857_v36 = vor.u32 1.1754944e-38, %v856_v29  ;;  %vm855_vm9 = vcmp.eq.f32.partialorder %v854_v31, 8.507059e+37 }
 0x338   : > { %v1311_v16 = vpop.eup %1310 }
 0x339   : > { %v846_v17 = vmul.f32 %v1311_v16, %v754_v15  ;;  %vm851_vm4 = vweird.f32 %v1311_v16 }
 0x33a   : > { %vm852_vm6 = vmor %vm850_vm5, %vm851_vm4 }
 0x33b   : > { %v760_v18 = vpop.xlane.xlu2 %759  ;;  %v847_v19 = vsub.f32 1.0, %v846_v17 }
 0x33c   : > { %1312 = vrcp.f32 %v760_v18  ;;  %v784_v20 = vpop.f32.mrf.mxu1  ;;  %v884_v32 = vand.u32 2147483648, %v760_v18  ;;  %v882_v34 = vand.u32 2147483647, %v760_v18  ;;  %vm878_vm8 = vweird.f32 %v760_v18 }
 0x33d   : > { %v848_v21 = vmul.f32 %v1311_v16, %v847_v19 }
 0x33e   : > { %v885_v39 = vor.u32 1.1754944e-38, %v884_v32  ;;  %vm883_vm11 = vcmp.eq.f32.partialorder %v882_v34, 8.507059e+37 }
 0x33f   : > { %v849_v27 = vadd.f32 %v1311_v16, %v848_v21 }
 0x341   : > { %v853_v35 = vsel %vm852_vm6, %v1311_v16, %v849_v27 }
 0x342   : > { %v1313_v22 = vpop.eup %1312  ;;  %v858_v41 = vsel %vm855_vm9, %v857_v36, %v853_v35 }
 0x343   : > { %v874_v23 = vmul.f32 %v1313_v22, %v760_v18  ;;  %v763_v25 = vpop.xlane.xlu1 %762  ;;  %v757_v26 = vpop.xlane.xlu2 %756  ;;  %vm879_vm7 = vweird.f32 %v1313_v22  ;;  %v901_v7 = vmul.f32 %v858_v41, %v784_v20 }
 0x344   : > { %1314 = vrcp.f32 %v763_v25  ;;  %v786_v30 = vpop.f32.mrf.mxu1  ;;  %vm880_vm10 = vmor %vm878_vm8, %vm879_vm7  ;;  %v870_v45 = vand.u32 2147483648, %v757_v26  ;;  %v898_v11 = vand.u32 2147483648, %v763_v25  ;;  %v896_v49 = vand.u32 2147483647, %v763_v25 }
 0x345   : > { %v875_v28 = vsub.f32 1.0, %v874_v23  ;;  %1316 = vrcp.f32 %v757_v26  ;;  %v868_v51 = vand.u32 2147483647, %v757_v26  ;;  %vm892_vm14 = vweird.f32 %v763_v25 }
 0x346   : > { %v908_v53 = vrot.slane %v901_v7, 4  ;;  %vm864_vm15 = vweird.f32 %v757_v26  ;;  %v899_v55 = vor.u32 1.1754944e-38, %v898_v11  ;;  %v871_v56 = vor.u32 1.1754944e-38, %v870_v45 }
 0x347   : > { %v876_v33 = vmul.f32 %v1313_v22, %v875_v28  ;;  %vm897_vm5 = vcmp.eq.f32.partialorder %v896_v49, 8.507059e+37  ;;  %vm869_vm6 = vcmp.eq.f32.partialorder %v868_v51, 8.507059e+37  ;;  %vm1029_vm7 = vcmask 130048  }
 0x348   : > { %vm1031_vm8 = vcmask 195584  }
 0x349   : > { %v877_v37 = vadd.f32 %v1313_v22, %v876_v33 }
 0x34a   : > { %v1315_v38 = vpop.eup %1314 }
 0x34b   : > { %v1317_v40 = vpop.eup %1316  ;;  %v888_v61 = vmul.f32 %v1315_v38, %v763_v25  ;;  %v803_v63 = vpop.f32.mrf.mxu2  ;;  %v881_v2 = vsel %vm880_vm10, %v1313_v22, %v877_v37  ;;  %vm893_vm12 = vweird.f32 %v1315_v38 }
 0x34c   : > { %v860_v42 = vmul.f32 %v1317_v40, %v757_v26  ;;  %v822_v43 = vpop.f32.mrf.mxu3  ;;  %v886_v6 = vsel %vm883_vm11, %v885_v39, %v881_v2  ;;  %vm865_vm13 = vweird.f32 %v1317_v40  ;;  %vm894_vm3 = vmor %vm892_vm14, %vm893_vm12 }
 0x34d   : > { %v889_v44 = vsub.f32 1.0, %v888_v61  ;;  %v903_v4 = vmul.f32 %v886_v6, %v822_v43  ;;  %vm866_vm4 = vmor %vm864_vm15, %vm865_vm13 }
 0x34e   : > { %v861_v8 = vsub.f32 1.0, %v860_v42  ;;  %v841_v46 = vpop.f32.mrf.mxu0 }
 0x34f   : > { %v905_v47 = vrot.slane %v903_v4, 4  ;;  %v890_v48 = vmul.f32 %v1315_v38, %v889_v44  ;;  %v909_v62 = vsel %vm315_vm1, %v903_v4, %v908_v53 }
 0x350   : > { %v862_v50 = vmul.f32 %v1317_v40, %v861_v8  ;;  %v917_v14 = vperm.slane %v909_v62, %v1636_v12 }
 0x351   : > { %v891_v52 = vadd.f32 %v1315_v38, %v890_v48  ;;  %v907_v57 = vsel %vm315_vm1, %v905_v47, %v901_v7 }
 0x352   : > { %v863_v54 = vadd.f32 %v1317_v40, %v862_v50  ;;  %v913_v10 = vperm.slane %v907_v57, %v1636_v12  ;;  %v944_v21 = vrot.slane %v917_v14, 4 }
 0x353   : > { %v895_v58 = vsel %vm894_vm3, %v1315_v38, %v891_v52  ;;  %v805_v59 = vpop.f32.mrf.mxu2 }
 0x354   : > { %v867_v60 = vsel %vm866_vm4, %v1317_v40, %v863_v54  ;;  %v900_v0 = vsel %vm897_vm5, %v899_v55, %v895_v58  ;;  %v824_v1 = vpop.f32.mrf.mxu3  ;;  %v932_v18 = vrot.slane %v913_v10, 4 }
 0x355   : > { %v872_v3 = vsel %vm869_vm6, %v871_v56, %v867_v60  ;;  %v904_v5 = vmul.f32 %v900_v0, %v841_v46  ;;  %v1221_v1 = vld [vmem:[#allocation7 + $0x8] sm:$0xff] }
 0x356   : > { %v902_v9 = vmul.f32 %v872_v3, %v803_v63  ;;  %v843_v13 = vpop.f32.mrf.mxu0  ;;  %1063 = vmatpush.bf16.msra.mxu1 %v1221_v1 }
 0x357   : > { %v918_v15 = vrot.slane %v904_v5, 4 }
 0x358   : > { %v920_v16 = vrot.slane %v902_v9, 4 }
 0x359   : > { %v919_v17 = vsel %vm315_vm1, %v918_v15, %v902_v9 }
 0x35a   : > { %v921_v19 = vsel %vm315_vm1, %v904_v5, %v920_v16  ;;  %v925_v20 = vperm.slane %v919_v17, %v1636_v12  ;;  %v1301_v16 = vld [vmem:[%s1870_s3] ss:$0 sm:$0xff] }
 0x35b   : > { %v929_v22 = vperm.slane %v921_v19, %v1636_v12 }
 0x35c   : > { %v930_v23 = vrot.slane %v925_v20, 4  ;;  %v933_v25 = vsel %vm315_vm1, %v925_v20, %v932_v18 }
 0x35d   : > { %v941_v26 = vperm.slane %v933_v25, %v1641_v24  ;;  %v942_v27 = vrot.slane %v929_v22, 4  ;;  %v945_v28 = vsel %vm315_vm1, %v929_v22, %v944_v21 }
 0x35e   : > { %v931_v29 = vsel %vm315_vm1, %v930_v23, %v913_v10  ;;  %v953_v30 = vperm.slane %v945_v28, %v1641_v24 }
 0x35f   : > { %v937_v31 = vperm.slane %v931_v29, %v1641_v24  ;;  %v943_v32 = vsel %vm315_vm1, %v942_v27, %v917_v14  ;;  %v956_v33 = vrot.slane %v941_v26, 4 }
 0x360   : > { %v949_v34 = vperm.slane %v943_v32, %v1641_v24  ;;  %v960_v35 = vrot.slane %v953_v30, 4 }
 0x361   : > { %v954_v36 = vrot.slane %v937_v31, 4  ;;  %v957_v37 = vsel %vm315_vm1, 0.0, %v956_v33  ;;  %v962_v38 = vsel %vm315_vm1, %v956_v33, %v937_v31 }
 0x362   : > { %v958_v39 = vrot.slane %v949_v34, 4  ;;  %v961_v40 = vsel %vm315_vm1, 0.0, %v960_v35  ;;  %v967_v41 = vrot.slane %v957_v37, 4  ;;  %v966_v61 = vperm.slane %v962_v38, %v1636_v12 }
 0x363   : > { %v978_v63 = vrot.slane %v961_v40, 4  ;;  %v955_v2 = vsel %vm315_vm1, 0.0, %v954_v36  ;;  %v973_v42 = vsel %vm315_vm1, %v960_v35, %v949_v34 }
 0x364   : > { %v959_v43 = vsel %vm315_vm1, 0.0, %v958_v39  ;;  %v968_v6 = vsel %vm315_vm1, %v967_v41, %v955_v2  ;;  %v977_v44 = vperm.slane %v973_v42, %v1636_v12  ;;  %v986_v4 = vrot.slane %v966_v61, 4 }
 0x365   : > { %v972_v7 = vperm.slane %v968_v6, %v1636_v12  ;;  %v979_v8 = vsel %vm315_vm1, %v978_v63, %v959_v43 }
 0x366   : > { %v983_v45 = vperm.slane %v979_v8, %v1636_v12  ;;  %v998_v46 = vrot.slane %v977_v44, 4 }
 0x367   : > { %v987_v11 = vsel %vm315_vm1, %v972_v7, %v986_v4  ;;  %v984_v47 = vrot.slane %v972_v7, 4 }
 0x368   : > { %v995_v48 = vperm.slane %v987_v11, %v1641_v24  ;;  %v999_v49 = vsel %vm315_vm1, %v983_v45, %v998_v46  ;;  %v996_v50 = vrot.slane %v983_v45, 4 }
 0x369   : > { %v1007_v51 = vperm.slane %v999_v49, %v1641_v24  ;;  %v985_v52 = vsel %vm315_vm1, %v984_v47, %v966_v61 }
 0x36a   : > { %v1014_v53 = vrot.slane %v995_v48, 4  ;;  %v991_v54 = vperm.slane %v985_v52, %v1641_v24  ;;  %v997_v55 = vsel %vm315_vm1, %v996_v50, %v977_v44 }
 0x36b   : > { %v1012_v56 = vrot.slane %v1007_v51, 4  ;;  %v1003_v12 = vperm.slane %v997_v55, %v1641_v24  ;;  %v1220_v24 = vld [vmem:[#allocation7] sm:$0xff] }
 0x36c   : > { %v1015_v57 = vsel %vm315_vm1, %v1007_v51, %v1014_v53  ;;  %v1010_v58 = vrot.slane %v991_v54, 4  ;;  %1064 = vmatpush.bf16.msra.mxu1 %v1220_v24 }
 0x36d   : > { %1025 = vrot.lane.b32.xlu2 %v1015_v57, %s1491_s6  ;;  %v1013_v59 = vsel %vm315_vm1, %v1012_v56, %v995_v48  ;;  %v1008_v60 = vrot.slane %v1003_v12, 4 }
 0x36e   : > { %1021 = vrot.lane.b32.xlu1 %v1013_v59, %s1492_s7  ;;  %v1011_v62 = vsel %vm315_vm1, %v1003_v12, %v1010_v58 }
 0x36f   : > { %1017 = vrot.lane.b32.xlu0 %v1011_v62, %s1493_s9  ;;  %v1009_v0 = vsel %vm315_vm1, %v1008_v60, %v991_v54 }
 0x3c7   : > { %v1026_v10 = vpop.permute.xlu2 %1025 }
 0x3e0   : > { %v1022_v5 = vpop.permute.xlu1 %1021 }
 0x3e1   : > { %v1018_v3 = vpop.permute.xlu0 %1017 }
 0x3e2   : > { %v1028_v9 = vsel %vm651_vm2, %v1009_v0, %v1018_v3 }
 0x3e3   : > { %v1030_v13 = vsel %vm1029_vm7, %v1028_v9, %v1022_v5 }
 0x3e4   : > { %v1032_v14 = vsel %vm1031_vm8, %v1030_v13, %v1026_v10 }
 0x3e5   : > { %v1033_v15 = vpack.c.bf16 %v1032_v14, %v1032_v14 }
 0x3e7   : > { %1213 = vmatmul.msk.bf16.vlgmr.msra.gmra.mxu1 %vm267_vm0, %v1033_v15 }
 0x464   : > { %v1066_v17 = vpop.f32.mrf.mxu1 }
 0x465   : > { %v1067_v18 = vadd.f32 %v1301_v16, %v1066_v17 }
 0x467   : > { %1070 = vst.msk [vmem:[%s247_s28] sm:$0xff] %vm267_vm0, %v1067_v18 }
 0x468   : > { %1435 = shalt.err (!%p1432_p9)
}
 0x469   : > { %1232 = dma.vmem_to_hbm [thread:$0]  (%p1588_p4), %s1085_s23, 128, %s1087_s13, %s1072_s22  }
 0x46c   : > { %v1068_v19 = vpop.f32.mrf.mxu1 }
 0x46d PF: > { %s1098_s14 = sand.u32 1, %s1466_s15   ;;  %p1878_p10 = scmp.ge.s32.totalorder %s1478_s18, 2 }
 0x46e   : > { %s1099_s10 = scalar_lea.sflag [#allocation4], %s1098_s14 }
 0x46f   : > { %p1246_p13 = pnand %p1878_p10, %p1592_p6 }
 0x471   : > { %p1247_p11 = pneg %p1246_p13 }
 0x473   : > { %1461 = dma.done.wait (%p1247_p11), %s1099_s10, 128  }
 0x474   : > { %1463 = vsyncadd (%p1247_p11), %s1099_s10, 4294967168  ;;  %p18_p0 = scmp.ge.s32.totalorder %s1562_s8, 4   ;;  %s1879_s15 = smov %s1470_s16 }
 0x475   : > { %s1880_s16 = smov %s1474_s17  ;;  %s1881_s17 = smov %s1573_s11 }
 0x476   : > { %s1882_s18 = smov %s1562_s8  ;;  %20 = sbr.rel (!%p18_p0) target bundleno = 6 (0x6), region = 89 }
 0x47b   :  { %1105 = vsyncpa [#allocation3], 1 }
 0x47c   :  { %1107 = vsyncpa [#allocation3 + $0x1], 1 }
 0x47d   :  { %1108 = vsyncpa [#allocation6], 1 }
 0x47e   :  { %1109 = vsyncpa [#allocation4], 1 }
 0x47f   :  { %1111 = vsyncpa [#allocation4 + $0x1], 1 }

</bundles_post_ra>
